<compile_context>
chip_gen: v6e
topology: v6e:2x2x1
jax: 0.10.0
libtpu: 0.0.40
codegen_flags: <defaults>
</compile_context>

<pallas_src>
import numpy as np
import jax
import jax.numpy as jnp
from jax.experimental import pallas as pl
from jax.experimental.pallas import tpu as pltpu


def _round_up(x, m):
    return (x + m - 1) // m * m


def _pad_gate_cols(w, H, Hp):
    """Zero-pad each of the 4 LSTM gate column-blocks from H to Hp lanes."""
    if Hp == H:
        return w.astype(jnp.float32)
    parts = []
    for k in range(4):
        g = w[..., k * H:(k + 1) * H]
        pad = [(0, 0)] * (g.ndim - 1) + [(0, Hp - H)]
        parts.append(jnp.pad(g, pad))
    return jnp.concatenate(parts, axis=-1).astype(jnp.float32)


def _encoding_kernel(x_ref, mask_ref, wlen_ref,
                     w_emb_ref, b_emb_ref,
                     w_ih_ref, w_hh_ref, b_gates_ref,
                     out_ref, gx_scr):
    Bp, Hp = out_ref.shape
    T, _, G = gx_scr.shape                # G == 4 * Hp

    # ---- Phase 1: hoisted input-to-hidden projection for ALL timesteps ------
    # emb = tanh(X @ W_emb + b_emb); dropout(0.5) == identity (eval mode).
    # The per-(t,b) row mask commutes with the W_ih matmul; the LSTM bias is
    # added unmasked, matching PyTorch (x_t = mask*emb; gates = x_t@W_ih + b).
    # TODO(synk): training-mode dropout mask/scaling is not reproduced.
    emb = jnp.tanh(
        jnp.dot(x_ref[...], w_emb_ref[...], preferred_element_type=jnp.float32)
        + b_emb_ref[...])
    emb = emb * mask_ref[...]                                   # (T*Bp, E)
    gx = (jnp.dot(emb, w_ih_ref[...], preferred_element_type=jnp.float32)
          + b_gates_ref[...])                                   # (T*Bp, 4Hp)
    gx_scr[...] = gx.reshape(T, Bp, G)                          # Bp % 8 == 0 -> layout-free

    wlen = wlen_ref[...]                                        # (Bp, 1) int32
    w_hh = w_hh_ref[...]                                        # loop-invariant
    h0 = jnp.zeros((Bp, Hp), jnp.float32)
    c0 = jnp.zeros((Bp, Hp), jnp.float32)
    o0 = jnp.zeros((Bp, Hp), jnp.float32)

    def sigmoid_tanh(z):                                        # 1 EUP push vs exp+div
        return 0.5 * (jnp.tanh(0.5 * z) + 1.0)

    # ---- Phase 2: recurrence (PyTorch gate order i, f, g, o), zero init -----
    # Per step: single (Bp,Hp)x(Hp,4Hp) MXU matmul + lane-aligned elementwise.
    def step(t, carry):
        h, c, out = carry
        gates = gx_scr[t] + jnp.dot(h, w_hh, preferred_element_type=jnp.float32)
        i_g = sigmoid_tanh(gates[:, 0 * Hp:1 * Hp])             # 128-lane-aligned slabs
        f_g = sigmoid_tanh(gates[:, 1 * Hp:2 * Hp])
        g_g = jnp.tanh(gates[:, 2 * Hp:3 * Hp])
        o_g = sigmoid_tanh(gates[:, 3 * Hp:4 * Hp])
        c_new = f_g * c + i_g * g_g
        h_new = o_g * jnp.tanh(c_new)
        # gather: keep h_t for rows whose words_len == t
        out_new = jnp.where(wlen == t, h_new, out)
        return (h_new, c_new, out_new)

    _, _, out = jax.lax.fori_loop(0, T, step, (h0, c0, o0), unroll=True)
    out_ref[...] = out                                          # one unmasked (8,128) tile


def encoding_model_forward(embeds, words_mask, words_len, params):
    """embeds (B,T,Din) f32, words_mask (B,T) f32, words_len (B,) int -> (B,1,H) f32."""
    w_emb, b_emb, w_ih, w_hh, b_gates = params
    B, T, Din = embeds.shape
    E = w_emb.shape[1]
    H = w_hh.shape[0]

    Bp = _round_up(max(B, 1), 8)      # f32 sublane alignment (MXU row fill)
    Hp = _round_up(max(H, 1), 128)    # lane-aligned gate slabs + lane-dense output

    # ---- pad & lay out weights (gate order preserved; pad lanes stay zero) --
    w_emb_p = w_emb.astype(jnp.float32)                              # (Din, E)
    b_emb_p = b_emb.astype(jnp.float32).reshape(1, E)                # (1, E)
    w_ih_p = _pad_gate_cols(w_ih.astype(jnp.float32), H, Hp)         # (E, 4Hp)
    w_hh_p = jnp.pad(w_hh.astype(jnp.float32), ((0, Hp - H), (0, 0)))
    w_hh_p = _pad_gate_cols(w_hh_p, H, Hp)                           # (Hp, 4Hp)
    b_g_p = _pad_gate_cols(b_gates.astype(jnp.float32).reshape(1, 4 * H), H, Hp)

    # ---- time-major, batch-padded, pre-flattened inputs ---------------------
    x_tm = jnp.transpose(embeds.astype(jnp.float32), (1, 0, 2))      # (T, B, Din)
    x_tm = jnp.pad(x_tm, ((0, 0), (0, Bp - B), (0, 0)))
    x_flat = x_tm.reshape(T * Bp, Din)

    m_tm = jnp.transpose(words_mask.astype(jnp.float32), (1, 0))     # (T, B)
    m_tm = jnp.pad(m_tm, ((0, 0), (0, Bp - B)))
    m_flat = m_tm.reshape(T * Bp, 1)                                 # skinny mask column

    wl = jnp.clip(words_len.astype(jnp.int32), 0, T - 1)             # defensive clamp
    wl = jnp.pad(wl, (0, Bp - B), constant_values=T)                 # pad rows never match
    wl = wl.reshape(Bp, 1)

    # TODO(synk): for production T/B on v7x, stream embeds from HBM over a grid
    # (memory_space=pl.ANY + emit_pipeline) and split Bp across TensorCores.
    vmem = pl.BlockSpec(memory_space=pltpu.MemorySpace.VMEM)
    out = pl.pallas_call(
        _encoding_kernel,
        out_shape=jax.ShapeDtypeStruct((Bp, Hp), jnp.float32),
        in_specs=[vmem] * 8,
        out_specs=vmem,
        scratch_shapes=[pltpu.VMEM((T, Bp, 4 * Hp), jnp.float32)],
    )(x_flat, m_flat, wl, w_emb_p, b_emb_p, w_ih_p, w_hh_p, b_g_p)
    return out[:B, None, :H]                                         # (B, 1, H)


def init_params(key, onehot_dim, embedding_dim, hidden_dim):
    """Deterministic synthetic params (PyTorch-like uniform init), pre-transposed."""
    k = jax.random.split(key, 6)
    s_e = 1.0 / np.sqrt(onehot_dim)
    w_emb = jax.random.uniform(k[0], (onehot_dim, embedding_dim), jnp.float32, -s_e, s_e)
    b_emb = jax.random.uniform(k[1], (1, embedding_dim), jnp.float32, -s_e, s_e)
    s_h = 1.0 / np.sqrt(hidden_dim)
    w_ih = jax.random.uniform(k[2], (embedding_dim, 4 * hidden_dim), jnp.float32, -s_h, s_h)
    w_hh = jax.random.uniform(k[3], (hidden_dim, 4 * hidden_dim), jnp.float32, -s_h, s_h)
    b_ih = jax.random.uniform(k[4], (1, 4 * hidden_dim), jnp.float32, -s_h, s_h)
    b_hh = jax.random.uniform(k[5], (1, 4 * hidden_dim), jnp.float32, -s_h, s_h)
    return w_emb, b_emb, w_ih, w_hh, b_ih + b_hh


def reference_forward(embeds, words_mask, words_len, params):
    """Pure-NumPy reference of the PyTorch forward (dropout = identity)."""
    w_emb, b_emb, w_ih, w_hh, b = [np.asarray(p, np.float32) for p in params]
    x = np.asarray(embeds, np.float32)
    m = np.asarray(words_mask, np.float32)
    B, T, Din = x.shape
    E = w_emb.shape[1]
    H = w_hh.shape[0]
    e = np.tanh(x.reshape(B * T, Din) @ w_emb + b_emb).reshape(B, T, E)
    e = e * m[:, :, None]
    h = np.zeros((B, H), np.float32)
    c = np.zeros((B, H), np.float32)
    outs = np.zeros((B, T, H), np.float32)

    def sig(z):
        return 1.0 / (1.0 + np.exp(-z))

    for t in range(T):
        g = e[:, t, :] @ w_ih + h @ w_hh + b
        i = sig(g[:, 0 * H:1 * H])
        f = sig(g[:, 1 * H:2 * H])
        gg = np.tanh(g[:, 2 * H:3 * H])
        o = sig(g[:, 3 * H:4 * H])
        c = f * c + i * gg
        h = o * np.tanh(c)
        outs[:, t, :] = h
    wl = np.asarray(words_len)
    return np.stack([outs[bb, wl[bb], :] for bb in range(B)])[:, None, :]


if __name__ == "__main__":
    B, T = 2, 8
    onehot_dim, embedding_dim, hidden_dim = 16, 32, 32

    key = jax.random.PRNGKey(0)
    kx, kp = jax.random.split(key)
    params = init_params(kp, onehot_dim, embedding_dim, hidden_dim)

    embeds = jax.random.normal(kx, (B, T, onehot_dim), jnp.float32)
    lens_np = np.array([5, 7], dtype=np.int32)      # timestep index gathered per row
    mask_np = np.zeros((B, T), np.float32)
    for bb in range(B):
        mask_np[bb, : lens_np[bb] + 1] = 1.0
    words_mask = jnp.asarray(mask_np)
    words_len = jnp.asarray(lens_np)

    out = encoding_model_forward(embeds, words_mask, words_len, params)
    out = jax.block_until_ready(out)
    assert out.shape == (B, 1, hidden_dim)

    ref = reference_forward(np.asarray(embeds), mask_np, lens_np, params)
    np.testing.assert_allclose(np.asarray(out), ref, rtol=1e-2, atol=1e-2)

    print("KERNEL_OK")
</pallas_src>

<mosaic_0001>
module attributes {stable_mosaic.version = 11 : i64} {
  func.func @_encoding_kernel(%arg0: memref<64x16xf32, #tpu.memory_space<vmem>>, %arg1: memref<64x1xf32, #tpu.memory_space<vmem>>, %arg2: memref<8x1xi32, #tpu.memory_space<vmem>>, %arg3: memref<16x32xf32, #tpu.memory_space<vmem>>, %arg4: memref<1x32xf32, #tpu.memory_space<vmem>>, %arg5: memref<32x512xf32, #tpu.memory_space<vmem>>, %arg6: memref<128x512xf32, #tpu.memory_space<vmem>>, %arg7: memref<1x512xf32, #tpu.memory_space<vmem>>, %arg8: memref<8x128xf32, #tpu.memory_space<vmem>>, %arg9: memref<8x8x512xf32, #tpu.memory_space<vmem>>) attributes {dimension_semantics = [], scalar_prefetch = 0 : i64, scratch_operands = 1 : i64, tpu.core_type = #tpu.core_type<tc>} {
    %c0 = arith.constant 0 : index
    %c0_0 = arith.constant 0 : index
    %0 = vector.load %arg0[%c0, %c0_0] : memref<64x16xf32, #tpu.memory_space<vmem>>, vector<64x16xf32>
    %c0_1 = arith.constant 0 : index
    %c0_2 = arith.constant 0 : index
    %1 = vector.load %arg3[%c0_1, %c0_2] : memref<16x32xf32, #tpu.memory_space<vmem>>, vector<16x32xf32>
    %cst = arith.constant dense<0.000000e+00> : vector<64x32xf32>
    %2 = tpu.matmul %0, %1, %cst {dimension_numbers = #tpu.dot_dimension_numbers<[1], [0], [0], [1], [0, 0, 1, 1], [], []>} : vector<64x16xf32>, vector<16x32xf32>, vector<64x32xf32> -> vector<64x32xf32>
    %c0_3 = arith.constant 0 : index
    %c0_4 = arith.constant 0 : index
    %3 = vector.load %arg4[%c0_3, %c0_4] : memref<1x32xf32, #tpu.memory_space<vmem>>, vector<1x32xf32>
    %4 = vector.broadcast %3 : vector<1x32xf32> to vector<64x32xf32>
    %5 = arith.addf %2, %4 : vector<64x32xf32>
    %6 = math.tanh %5 : vector<64x32xf32>
    %c0_5 = arith.constant 0 : index
    %c0_6 = arith.constant 0 : index
    %7 = vector.load %arg1[%c0_5, %c0_6] : memref<64x1xf32, #tpu.memory_space<vmem>>, vector<64x1xf32>
    %8 = vector.broadcast %7 : vector<64x1xf32> to vector<64x32xf32>
    %9 = arith.mulf %6, %8 : vector<64x32xf32>
    %c0_7 = arith.constant 0 : index
    %c0_8 = arith.constant 0 : index
    %10 = vector.load %arg5[%c0_7, %c0_8] : memref<32x512xf32, #tpu.memory_space<vmem>>, vector<32x512xf32>
    %cst_9 = arith.constant dense<0.000000e+00> : vector<64x512xf32>
    %11 = tpu.matmul %9, %10, %cst_9 {dimension_numbers = #tpu.dot_dimension_numbers<[1], [0], [0], [1], [0, 0, 1, 1], [], []>} : vector<64x32xf32>, vector<32x512xf32>, vector<64x512xf32> -> vector<64x512xf32>
    %c0_10 = arith.constant 0 : index
    %c0_11 = arith.constant 0 : index
    %12 = vector.load %arg7[%c0_10, %c0_11] : memref<1x512xf32, #tpu.memory_space<vmem>>, vector<1x512xf32>
    %13 = vector.broadcast %12 : vector<1x512xf32> to vector<64x512xf32>
    %14 = arith.addf %11, %13 : vector<64x512xf32>
    %15 = vector.shape_cast %14 : vector<64x512xf32> to vector<8x8x512xf32>
    %c0_12 = arith.constant 0 : index
    %c0_13 = arith.constant 0 : index
    %c0_14 = arith.constant 0 : index
    %16 = vector.load %arg9[%c0_12, %c0_13, %c0_14] : memref<8x8x512xf32, #tpu.memory_space<vmem>>, vector<8x8x512xf32>
    tpu.vector_store %arg9[%c0_12, %c0_13, %c0_14], %15 {strides = array<i32>} : memref<8x8x512xf32, #tpu.memory_space<vmem>>, vector<8x8x512xf32>,
    %c0_15 = arith.constant 0 : index
    %c0_16 = arith.constant 0 : index
    %17 = vector.load %arg2[%c0_15, %c0_16] : memref<8x1xi32, #tpu.memory_space<vmem>>, vector<8x1xi32>
    %c0_17 = arith.constant 0 : index
    %c0_18 = arith.constant 0 : index
    %18 = vector.load %arg6[%c0_17, %c0_18] : memref<128x512xf32, #tpu.memory_space<vmem>>, vector<128x512xf32>
    %cst_19 = arith.constant 0.000000e+00 : f32
    %19 = vector.broadcast %cst_19 : f32 to vector<8x128xf32>
    %cst_20 = arith.constant 0.000000e+00 : f32
    %20 = vector.broadcast %cst_20 : f32 to vector<8x128xf32>
    %cst_21 = arith.constant 0.000000e+00 : f32
    %21 = vector.broadcast %cst_21 : f32 to vector<8x128xf32>
    %c0_i32 = arith.constant 0 : i32
    %22 = arith.index_cast %c0_i32 : i32 to index
    %c0_22 = arith.constant 0 : index
    %c0_23 = arith.constant 0 : index
    %23 = vector.load %arg9[%22, %c0_22, %c0_23] : memref<8x8x512xf32, #tpu.memory_space<vmem>>, vector<1x8x512xf32>
    %24 = vector.shape_cast %23 : vector<1x8x512xf32> to vector<8x512xf32>
    %cst_24 = arith.constant dense<0.000000e+00> : vector<8x512xf32>
    %25 = tpu.matmul %19, %18, %cst_24 {dimension_numbers = #tpu.dot_dimension_numbers<[1], [0], [0], [1], [0, 0, 1, 1], [], []>} : vector<8x128xf32>, vector<128x512xf32>, vector<8x512xf32> -> vector<8x512xf32>
    %26 = arith.addf %24, %25 : vector<8x512xf32>
    %27 = vector.extract_strided_slice %26 {offsets = [0, 0], sizes = [8, 128], strides = [1, 1]} : vector<8x512xf32> to vector<8x128xf32>
    %cst_25 = arith.constant 5.000000e-01 : f32
    %28 = vector.broadcast %cst_25 : f32 to vector<8x128xf32>
    %29 = arith.mulf %28, %27 : vector<8x128xf32>
    %30 = math.tanh %29 : vector<8x128xf32>
    %cst_26 = arith.constant 1.000000e+00 : f32
    %31 = vector.broadcast %cst_26 : f32 to vector<8x128xf32>
    %32 = arith.addf %30, %31 : vector<8x128xf32>
    %cst_27 = arith.constant 5.000000e-01 : f32
    %33 = vector.broadcast %cst_27 : f32 to vector<8x128xf32>
    %34 = arith.mulf %33, %32 : vector<8x128xf32>
    %35 = vector.extract_strided_slice %26 {offsets = [0, 128], sizes = [8, 128], strides = [1, 1]} : vector<8x512xf32> to vector<8x128xf32>
    %cst_28 = arith.constant 5.000000e-01 : f32
    %36 = vector.broadcast %cst_28 : f32 to vector<8x128xf32>
    %37 = arith.mulf %36, %35 : vector<8x128xf32>
    %38 = math.tanh %37 : vector<8x128xf32>
    %cst_29 = arith.constant 1.000000e+00 : f32
    %39 = vector.broadcast %cst_29 : f32 to vector<8x128xf32>
    %40 = arith.addf %38, %39 : vector<8x128xf32>
    %cst_30 = arith.constant 5.000000e-01 : f32
    %41 = vector.broadcast %cst_30 : f32 to vector<8x128xf32>
    %42 = arith.mulf %41, %40 : vector<8x128xf32>
    %43 = vector.extract_strided_slice %26 {offsets = [0, 256], sizes = [8, 128], strides = [1, 1]} : vector<8x512xf32> to vector<8x128xf32>
    %44 = math.tanh %43 : vector<8x128xf32>
    %45 = vector.extract_strided_slice %26 {offsets = [0, 384], sizes = [8, 128], strides = [1, 1]} : vector<8x512xf32> to vector<8x128xf32>
    %cst_31 = arith.constant 5.000000e-01 : f32
    %46 = vector.broadcast %cst_31 : f32 to vector<8x128xf32>
    %47 = arith.mulf %46, %45 : vector<8x128xf32>
    %48 = math.tanh %47 : vector<8x128xf32>
    %cst_32 = arith.constant 1.000000e+00 : f32
    %49 = vector.broadcast %cst_32 : f32 to vector<8x128xf32>
    %50 = arith.addf %48, %49 : vector<8x128xf32>
    %cst_33 = arith.constant 5.000000e-01 : f32
    %51 = vector.broadcast %cst_33 : f32 to vector<8x128xf32>
    %52 = arith.mulf %51, %50 : vector<8x128xf32>
    %53 = arith.mulf %42, %20 : vector<8x128xf32>
    %54 = arith.mulf %34, %44 : vector<8x128xf32>
    %55 = arith.addf %53, %54 : vector<8x128xf32>
    %56 = math.tanh %55 : vector<8x128xf32>
    %57 = arith.mulf %52, %56 : vector<8x128xf32>
    %58 = vector.broadcast %c0_i32 : i32 to vector<8x1xi32>
    %59 = arith.cmpi eq, %17, %58 : vector<8x1xi32>
    %60 = vector.shape_cast %59 : vector<8x1xi1> to vector<8x1xi1>
    %61 = vector.broadcast %60 : vector<8x1xi1> to vector<8x128xi1>
    %62 = arith.select %61, %57, %21 : vector<8x128xi1>, vector<8x128xf32>
    %c1_i32 = arith.constant 1 : i32
    %63 = arith.index_cast %c1_i32 : i32 to index
    %c0_34 = arith.constant 0 : index
    %c0_35 = arith.constant 0 : index
    %64 = vector.load %arg9[%63, %c0_34, %c0_35] : memref<8x8x512xf32, #tpu.memory_space<vmem>>, vector<1x8x512xf32>
    %65 = vector.shape_cast %64 : vector<1x8x512xf32> to vector<8x512xf32>
    %cst_36 = arith.constant dense<0.000000e+00> : vector<8x512xf32>
    %66 = tpu.matmul %57, %18, %cst_36 {dimension_numbers = #tpu.dot_dimension_numbers<[1], [0], [0], [1], [0, 0, 1, 1], [], []>} : vector<8x128xf32>, vector<128x512xf32>, vector<8x512xf32> -> vector<8x512xf32>
    %67 = arith.addf %65, %66 : vector<8x512xf32>
    %68 = vector.extract_strided_slice %67 {offsets = [0, 0], sizes = [8, 128], strides = [1, 1]} : vector<8x512xf32> to vector<8x128xf32>
    %cst_37 = arith.constant 5.000000e-01 : f32
    %69 = vector.broadcast %cst_37 : f32 to vector<8x128xf32>
    %70 = arith.mulf %69, %68 : vector<8x128xf32>
    %71 = math.tanh %70 : vector<8x128xf32>
    %cst_38 = arith.constant 1.000000e+00 : f32
    %72 = vector.broadcast %cst_38 : f32 to vector<8x128xf32>
    %73 = arith.addf %71, %72 : vector<8x128xf32>
    %cst_39 = arith.constant 5.000000e-01 : f32
    %74 = vector.broadcast %cst_39 : f32 to vector<8x128xf32>
    %75 = arith.mulf %74, %73 : vector<8x128xf32>
    %76 = vector.extract_strided_slice %67 {offsets = [0, 128], sizes = [8, 128], strides = [1, 1]} : vector<8x512xf32> to vector<8x128xf32>
    %cst_40 = arith.constant 5.000000e-01 : f32
    %77 = vector.broadcast %cst_40 : f32 to vector<8x128xf32>
    %78 = arith.mulf %77, %76 : vector<8x128xf32>
    %79 = math.tanh %78 : vector<8x128xf32>
    %cst_41 = arith.constant 1.000000e+00 : f32
    %80 = vector.broadcast %cst_41 : f32 to vector<8x128xf32>
    %81 = arith.addf %79, %80 : vector<8x128xf32>
    %cst_42 = arith.constant 5.000000e-01 : f32
    %82 = vector.broadcast %cst_42 : f32 to vector<8x128xf32>
    %83 = arith.mulf %82, %81 : vector<8x128xf32>
    %84 = vector.extract_strided_slice %67 {offsets = [0, 256], sizes = [8, 128], strides = [1, 1]} : vector<8x512xf32> to vector<8x128xf32>
    %85 = math.tanh %84 : vector<8x128xf32>
    %86 = vector.extract_strided_slice %67 {offsets = [0, 384], sizes = [8, 128], strides = [1, 1]} : vector<8x512xf32> to vector<8x128xf32>
    %cst_43 = arith.constant 5.000000e-01 : f32
    %87 = vector.broadcast %cst_43 : f32 to vector<8x128xf32>
    %88 = arith.mulf %87, %86 : vector<8x128xf32>
    %89 = math.tanh %88 : vector<8x128xf32>
    %cst_44 = arith.constant 1.000000e+00 : f32
    %90 = vector.broadcast %cst_44 : f32 to vector<8x128xf32>
    %91 = arith.addf %89, %90 : vector<8x128xf32>
    %cst_45 = arith.constant 5.000000e-01 : f32
    %92 = vector.broadcast %cst_45 : f32 to vector<8x128xf32>
    %93 = arith.mulf %92, %91 : vector<8x128xf32>
    %94 = arith.mulf %83, %55 : vector<8x128xf32>
    %95 = arith.mulf %75, %85 : vector<8x128xf32>
    %96 = arith.addf %94, %95 : vector<8x128xf32>
    %97 = math.tanh %96 : vector<8x128xf32>
    %98 = arith.mulf %93, %97 : vector<8x128xf32>
    %99 = vector.broadcast %c1_i32 : i32 to vector<8x1xi32>
    %100 = arith.cmpi eq, %17, %99 : vector<8x1xi32>
    %101 = vector.shape_cast %100 : vector<8x1xi1> to vector<8x1xi1>
    %102 = vector.broadcast %101 : vector<8x1xi1> to vector<8x128xi1>
    %103 = arith.select %102, %98, %62 : vector<8x128xi1>, vector<8x128xf32>
    %c2_i32 = arith.constant 2 : i32
    %104 = arith.index_cast %c2_i32 : i32 to index
    %c0_46 = arith.constant 0 : index
    %c0_47 = arith.constant 0 : index
    %105 = vector.load %arg9[%104, %c0_46, %c0_47] : memref<8x8x512xf32, #tpu.memory_space<vmem>>, vector<1x8x512xf32>
    %106 = vector.shape_cast %105 : vector<1x8x512xf32> to vector<8x512xf32>
    %cst_48 = arith.constant dense<0.000000e+00> : vector<8x512xf32>
    %107 = tpu.matmul %98, %18, %cst_48 {dimension_numbers = #tpu.dot_dimension_numbers<[1], [0], [0], [1], [0, 0, 1, 1], [], []>} : vector<8x128xf32>, vector<128x512xf32>, vector<8x512xf32> -> vector<8x512xf32>
    %108 = arith.addf %106, %107 : vector<8x512xf32>
    %109 = vector.extract_strided_slice %108 {offsets = [0, 0], sizes = [8, 128], strides = [1, 1]} : vector<8x512xf32> to vector<8x128xf32>
    %cst_49 = arith.constant 5.000000e-01 : f32
    %110 = vector.broadcast %cst_49 : f32 to vector<8x128xf32>
    %111 = arith.mulf %110, %109 : vector<8x128xf32>
    %112 = math.tanh %111 : vector<8x128xf32>
    %cst_50 = arith.constant 1.000000e+00 : f32
    %113 = vector.broadcast %cst_50 : f32 to vector<8x128xf32>
    %114 = arith.addf %112, %113 : vector<8x128xf32>
    %cst_51 = arith.constant 5.000000e-01 : f32
    %115 = vector.broadcast %cst_51 : f32 to vector<8x128xf32>
    %116 = arith.mulf %115, %114 : vector<8x128xf32>
    %117 = vector.extract_strided_slice %108 {offsets = [0, 128], sizes = [8, 128], strides = [1, 1]} : vector<8x512xf32> to vector<8x128xf32>
    %cst_52 = arith.constant 5.000000e-01 : f32
    %118 = vector.broadcast %cst_52 : f32 to vector<8x128xf32>
    %119 = arith.mulf %118, %117 : vector<8x128xf32>
    %120 = math.tanh %119 : vector<8x128xf32>
    %cst_53 = arith.constant 1.000000e+00 : f32
    %121 = vector.broadcast %cst_53 : f32 to vector<8x128xf32>
    %122 = arith.addf %120, %121 : vector<8x128xf32>
    %cst_54 = arith.constant 5.000000e-01 : f32
    %123 = vector.broadcast %cst_54 : f32 to vector<8x128xf32>
    %124 = arith.mulf %123, %122 : vector<8x128xf32>
    %125 = vector.extract_strided_slice %108 {offsets = [0, 256], sizes = [8, 128], strides = [1, 1]} : vector<8x512xf32> to vector<8x128xf32>
    %126 = math.tanh %125 : vector<8x128xf32>
    %127 = vector.extract_strided_slice %108 {offsets = [0, 384], sizes = [8, 128], strides = [1, 1]} : vector<8x512xf32> to vector<8x128xf32>
    %cst_55 = arith.constant 5.000000e-01 : f32
    %128 = vector.broadcast %cst_55 : f32 to vector<8x128xf32>
    %129 = arith.mulf %128, %127 : vector<8x128xf32>
    %130 = math.tanh %129 : vector<8x128xf32>
    %cst_56 = arith.constant 1.000000e+00 : f32
    %131 = vector.broadcast %cst_56 : f32 to vector<8x128xf32>
    %132 = arith.addf %130, %131 : vector<8x128xf32>
    %cst_57 = arith.constant 5.000000e-01 : f32
    %133 = vector.broadcast %cst_57 : f32 to vector<8x128xf32>
    %134 = arith.mulf %133, %132 : vector<8x128xf32>
    %135 = arith.mulf %124, %96 : vector<8x128xf32>
    %136 = arith.mulf %116, %126 : vector<8x128xf32>
    %137 = arith.addf %135, %136 : vector<8x128xf32>
    %138 = math.tanh %137 : vector<8x128xf32>
    %139 = arith.mulf %134, %138 : vector<8x128xf32>
    %140 = vector.broadcast %c2_i32 : i32 to vector<8x1xi32>
    %141 = arith.cmpi eq, %17, %140 : vector<8x1xi32>
    %142 = vector.shape_cast %141 : vector<8x1xi1> to vector<8x1xi1>
    %143 = vector.broadcast %142 : vector<8x1xi1> to vector<8x128xi1>
    %144 = arith.select %143, %139, %103 : vector<8x128xi1>, vector<8x128xf32>
    %c3_i32 = arith.constant 3 : i32
    %145 = arith.index_cast %c3_i32 : i32 to index
    %c0_58 = arith.constant 0 : index
    %c0_59 = arith.constant 0 : index
    %146 = vector.load %arg9[%145, %c0_58, %c0_59] : memref<8x8x512xf32, #tpu.memory_space<vmem>>, vector<1x8x512xf32>
    %147 = vector.shape_cast %146 : vector<1x8x512xf32> to vector<8x512xf32>
    %cst_60 = arith.constant dense<0.000000e+00> : vector<8x512xf32>
    %148 = tpu.matmul %139, %18, %cst_60 {dimension_numbers = #tpu.dot_dimension_numbers<[1], [0], [0], [1], [0, 0, 1, 1], [], []>} : vector<8x128xf32>, vector<128x512xf32>, vector<8x512xf32> -> vector<8x512xf32>
    %149 = arith.addf %147, %148 : vector<8x512xf32>
    %150 = vector.extract_strided_slice %149 {offsets = [0, 0], sizes = [8, 128], strides = [1, 1]} : vector<8x512xf32> to vector<8x128xf32>
    %cst_61 = arith.constant 5.000000e-01 : f32
    %151 = vector.broadcast %cst_61 : f32 to vector<8x128xf32>
    %152 = arith.mulf %151, %150 : vector<8x128xf32>
    %153 = math.tanh %152 : vector<8x128xf32>
    %cst_62 = arith.constant 1.000000e+00 : f32
    %154 = vector.broadcast %cst_62 : f32 to vector<8x128xf32>
    %155 = arith.addf %153, %154 : vector<8x128xf32>
    %cst_63 = arith.constant 5.000000e-01 : f32
    %156 = vector.broadcast %cst_63 : f32 to vector<8x128xf32>
    %157 = arith.mulf %156, %155 : vector<8x128xf32>
    %158 = vector.extract_strided_slice %149 {offsets = [0, 128], sizes = [8, 128], strides = [1, 1]} : vector<8x512xf32> to vector<8x128xf32>
    %cst_64 = arith.constant 5.000000e-01 : f32
    %159 = vector.broadcast %cst_64 : f32 to vector<8x128xf32>
    %160 = arith.mulf %159, %158 : vector<8x128xf32>
    %161 = math.tanh %160 : vector<8x128xf32>
    %cst_65 = arith.constant 1.000000e+00 : f32
    %162 = vector.broadcast %cst_65 : f32 to vector<8x128xf32>
    %163 = arith.addf %161, %162 : vector<8x128xf32>
    %cst_66 = arith.constant 5.000000e-01 : f32
    %164 = vector.broadcast %cst_66 : f32 to vector<8x128xf32>
    %165 = arith.mulf %164, %163 : vector<8x128xf32>
    %166 = vector.extract_strided_slice %149 {offsets = [0, 256], sizes = [8, 128], strides = [1, 1]} : vector<8x512xf32> to vector<8x128xf32>
    %167 = math.tanh %166 : vector<8x128xf32>
    %168 = vector.extract_strided_slice %149 {offsets = [0, 384], sizes = [8, 128], strides = [1, 1]} : vector<8x512xf32> to vector<8x128xf32>
    %cst_67 = arith.constant 5.000000e-01 : f32
    %169 = vector.broadcast %cst_67 : f32 to vector<8x128xf32>
    %170 = arith.mulf %169, %168 : vector<8x128xf32>
    %171 = math.tanh %170 : vector<8x128xf32>
    %cst_68 = arith.constant 1.000000e+00 : f32
    %172 = vector.broadcast %cst_68 : f32 to vector<8x128xf32>
    %173 = arith.addf %171, %172 : vector<8x128xf32>
    %cst_69 = arith.constant 5.000000e-01 : f32
    %174 = vector.broadcast %cst_69 : f32 to vector<8x128xf32>
    %175 = arith.mulf %174, %173 : vector<8x128xf32>
    %176 = arith.mulf %165, %137 : vector<8x128xf32>
    %177 = arith.mulf %157, %167 : vector<8x128xf32>
    %178 = arith.addf %176, %177 : vector<8x128xf32>
    %179 = math.tanh %178 : vector<8x128xf32>
    %180 = arith.mulf %175, %179 : vector<8x128xf32>
    %181 = vector.broadcast %c3_i32 : i32 to vector<8x1xi32>
    %182 = arith.cmpi eq, %17, %181 : vector<8x1xi32>
    %183 = vector.shape_cast %182 : vector<8x1xi1> to vector<8x1xi1>
    %184 = vector.broadcast %183 : vector<8x1xi1> to vector<8x128xi1>
    %185 = arith.select %184, %180, %144 : vector<8x128xi1>, vector<8x128xf32>
    %c4_i32 = arith.constant 4 : i32
    %186 = arith.index_cast %c4_i32 : i32 to index
    %c0_70 = arith.constant 0 : index
    %c0_71 = arith.constant 0 : index
    %187 = vector.load %arg9[%186, %c0_70, %c0_71] : memref<8x8x512xf32, #tpu.memory_space<vmem>>, vector<1x8x512xf32>
    %188 = vector.shape_cast %187 : vector<1x8x512xf32> to vector<8x512xf32>
    %cst_72 = arith.constant dense<0.000000e+00> : vector<8x512xf32>
    %189 = tpu.matmul %180, %18, %cst_72 {dimension_numbers = #tpu.dot_dimension_numbers<[1], [0], [0], [1], [0, 0, 1, 1], [], []>} : vector<8x128xf32>, vector<128x512xf32>, vector<8x512xf32> -> vector<8x512xf32>
    %190 = arith.addf %188, %189 : vector<8x512xf32>
    %191 = vector.extract_strided_slice %190 {offsets = [0, 0], sizes = [8, 128], strides = [1, 1]} : vector<8x512xf32> to vector<8x128xf32>
    %cst_73 = arith.constant 5.000000e-01 : f32
    %192 = vector.broadcast %cst_73 : f32 to vector<8x128xf32>
    %193 = arith.mulf %192, %191 : vector<8x128xf32>
    %194 = math.tanh %193 : vector<8x128xf32>
    %cst_74 = arith.constant 1.000000e+00 : f32
    %195 = vector.broadcast %cst_74 : f32 to vector<8x128xf32>
    %196 = arith.addf %194, %195 : vector<8x128xf32>
    %cst_75 = arith.constant 5.000000e-01 : f32
    %197 = vector.broadcast %cst_75 : f32 to vector<8x128xf32>
    %198 = arith.mulf %197, %196 : vector<8x128xf32>
    %199 = vector.extract_strided_slice %190 {offsets = [0, 128], sizes = [8, 128], strides = [1, 1]} : vector<8x512xf32> to vector<8x128xf32>
    %cst_76 = arith.constant 5.000000e-01 : f32
    %200 = vector.broadcast %cst_76 : f32 to vector<8x128xf32>
    %201 = arith.mulf %200, %199 : vector<8x128xf32>
    %202 = math.tanh %201 : vector<8x128xf32>
    %cst_77 = arith.constant 1.000000e+00 : f32
    %203 = vector.broadcast %cst_77 : f32 to vector<8x128xf32>
    %204 = arith.addf %202, %203 : vector<8x128xf32>
    %cst_78 = arith.constant 5.000000e-01 : f32
    %205 = vector.broadcast %cst_78 : f32 to vector<8x128xf32>
    %206 = arith.mulf %205, %204 : vector<8x128xf32>
    %207 = vector.extract_strided_slice %190 {offsets = [0, 256], sizes = [8, 128], strides = [1, 1]} : vector<8x512xf32> to vector<8x128xf32>
    %208 = math.tanh %207 : vector<8x128xf32>
    %209 = vector.extract_strided_slice %190 {offsets = [0, 384], sizes = [8, 128], strides = [1, 1]} : vector<8x512xf32> to vector<8x128xf32>
    %cst_79 = arith.constant 5.000000e-01 : f32
    %210 = vector.broadcast %cst_79 : f32 to vector<8x128xf32>
    %211 = arith.mulf %210, %209 : vector<8x128xf32>
    %212 = math.tanh %211 : vector<8x128xf32>
    %cst_80 = arith.constant 1.000000e+00 : f32
    %213 = vector.broadcast %cst_80 : f32 to vector<8x128xf32>
    %214 = arith.addf %212, %213 : vector<8x128xf32>
    %cst_81 = arith.constant 5.000000e-01 : f32
    %215 = vector.broadcast %cst_81 : f32 to vector<8x128xf32>
    %216 = arith.mulf %215, %214 : vector<8x128xf32>
    %217 = arith.mulf %206, %178 : vector<8x128xf32>
    %218 = arith.mulf %198, %208 : vector<8x128xf32>
    %219 = arith.addf %217, %218 : vector<8x128xf32>
    %220 = math.tanh %219 : vector<8x128xf32>
    %221 = arith.mulf %216, %220 : vector<8x128xf32>
    %222 = vector.broadcast %c4_i32 : i32 to vector<8x1xi32>
    %223 = arith.cmpi eq, %17, %222 : vector<8x1xi32>
    %224 = vector.shape_cast %223 : vector<8x1xi1> to vector<8x1xi1>
    %225 = vector.broadcast %224 : vector<8x1xi1> to vector<8x128xi1>
    %226 = arith.select %225, %221, %185 : vector<8x128xi1>, vector<8x128xf32>
    %c5_i32 = arith.constant 5 : i32
    %227 = arith.index_cast %c5_i32 : i32 to index
    %c0_82 = arith.constant 0 : index
    %c0_83 = arith.constant 0 : index
    %228 = vector.load %arg9[%227, %c0_82, %c0_83] : memref<8x8x512xf32, #tpu.memory_space<vmem>>, vector<1x8x512xf32>
    %229 = vector.shape_cast %228 : vector<1x8x512xf32> to vector<8x512xf32>
    %cst_84 = arith.constant dense<0.000000e+00> : vector<8x512xf32>
    %230 = tpu.matmul %221, %18, %cst_84 {dimension_numbers = #tpu.dot_dimension_numbers<[1], [0], [0], [1], [0, 0, 1, 1], [], []>} : vector<8x128xf32>, vector<128x512xf32>, vector<8x512xf32> -> vector<8x512xf32>
    %231 = arith.addf %229, %230 : vector<8x512xf32>
    %232 = vector.extract_strided_slice %231 {offsets = [0, 0], sizes = [8, 128], strides = [1, 1]} : vector<8x512xf32> to vector<8x128xf32>
    %cst_85 = arith.constant 5.000000e-01 : f32
    %233 = vector.broadcast %cst_85 : f32 to vector<8x128xf32>
    %234 = arith.mulf %233, %232 : vector<8x128xf32>
    %235 = math.tanh %234 : vector<8x128xf32>
    %cst_86 = arith.constant 1.000000e+00 : f32
    %236 = vector.broadcast %cst_86 : f32 to vector<8x128xf32>
    %237 = arith.addf %235, %236 : vector<8x128xf32>
    %cst_87 = arith.constant 5.000000e-01 : f32
    %238 = vector.broadcast %cst_87 : f32 to vector<8x128xf32>
    %239 = arith.mulf %238, %237 : vector<8x128xf32>
    %240 = vector.extract_strided_slice %231 {offsets = [0, 128], sizes = [8, 128], strides = [1, 1]} : vector<8x512xf32> to vector<8x128xf32>
    %cst_88 = arith.constant 5.000000e-01 : f32
    %241 = vector.broadcast %cst_88 : f32 to vector<8x128xf32>
    %242 = arith.mulf %241, %240 : vector<8x128xf32>
    %243 = math.tanh %242 : vector<8x128xf32>
    %cst_89 = arith.constant 1.000000e+00 : f32
    %244 = vector.broadcast %cst_89 : f32 to vector<8x128xf32>
    %245 = arith.addf %243, %244 : vector<8x128xf32>
    %cst_90 = arith.constant 5.000000e-01 : f32
    %246 = vector.broadcast %cst_90 : f32 to vector<8x128xf32>
    %247 = arith.mulf %246, %245 : vector<8x128xf32>
    %248 = vector.extract_strided_slice %231 {offsets = [0, 256], sizes = [8, 128], strides = [1, 1]} : vector<8x512xf32> to vector<8x128xf32>
    %249 = math.tanh %248 : vector<8x128xf32>
    %250 = vector.extract_strided_slice %231 {offsets = [0, 384], sizes = [8, 128], strides = [1, 1]} : vector<8x512xf32> to vector<8x128xf32>
    %cst_91 = arith.constant 5.000000e-01 : f32
    %251 = vector.broadcast %cst_91 : f32 to vector<8x128xf32>
    %252 = arith.mulf %251, %250 : vector<8x128xf32>
    %253 = math.tanh %252 : vector<8x128xf32>
    %cst_92 = arith.constant 1.000000e+00 : f32
    %254 = vector.broadcast %cst_92 : f32 to vector<8x128xf32>
    %255 = arith.addf %253, %254 : vector<8x128xf32>
    %cst_93 = arith.constant 5.000000e-01 : f32
    %256 = vector.broadcast %cst_93 : f32 to vector<8x128xf32>
    %257 = arith.mulf %256, %255 : vector<8x128xf32>
    %258 = arith.mulf %247, %219 : vector<8x128xf32>
    %259 = arith.mulf %239, %249 : vector<8x128xf32>
    %260 = arith.addf %258, %259 : vector<8x128xf32>
    %261 = math.tanh %260 : vector<8x128xf32>
    %262 = arith.mulf %257, %261 : vector<8x128xf32>
    %263 = vector.broadcast %c5_i32 : i32 to vector<8x1xi32>
    %264 = arith.cmpi eq, %17, %263 : vector<8x1xi32>
    %265 = vector.shape_cast %264 : vector<8x1xi1> to vector<8x1xi1>
    %266 = vector.broadcast %265 : vector<8x1xi1> to vector<8x128xi1>
    %267 = arith.select %266, %262, %226 : vector<8x128xi1>, vector<8x128xf32>
    %c6_i32 = arith.constant 6 : i32
    %268 = arith.index_cast %c6_i32 : i32 to index
    %c0_94 = arith.constant 0 : index
    %c0_95 = arith.constant 0 : index
    %269 = vector.load %arg9[%268, %c0_94, %c0_95] : memref<8x8x512xf32, #tpu.memory_space<vmem>>, vector<1x8x512xf32>
    %270 = vector.shape_cast %269 : vector<1x8x512xf32> to vector<8x512xf32>
    %cst_96 = arith.constant dense<0.000000e+00> : vector<8x512xf32>
    %271 = tpu.matmul %262, %18, %cst_96 {dimension_numbers = #tpu.dot_dimension_numbers<[1], [0], [0], [1], [0, 0, 1, 1], [], []>} : vector<8x128xf32>, vector<128x512xf32>, vector<8x512xf32> -> vector<8x512xf32>
    %272 = arith.addf %270, %271 : vector<8x512xf32>
    %273 = vector.extract_strided_slice %272 {offsets = [0, 0], sizes = [8, 128], strides = [1, 1]} : vector<8x512xf32> to vector<8x128xf32>
    %cst_97 = arith.constant 5.000000e-01 : f32
    %274 = vector.broadcast %cst_97 : f32 to vector<8x128xf32>
    %275 = arith.mulf %274, %273 : vector<8x128xf32>
    %276 = math.tanh %275 : vector<8x128xf32>
    %cst_98 = arith.constant 1.000000e+00 : f32
    %277 = vector.broadcast %cst_98 : f32 to vector<8x128xf32>
    %278 = arith.addf %276, %277 : vector<8x128xf32>
    %cst_99 = arith.constant 5.000000e-01 : f32
    %279 = vector.broadcast %cst_99 : f32 to vector<8x128xf32>
    %280 = arith.mulf %279, %278 : vector<8x128xf32>
    %281 = vector.extract_strided_slice %272 {offsets = [0, 128], sizes = [8, 128], strides = [1, 1]} : vector<8x512xf32> to vector<8x128xf32>
    %cst_100 = arith.constant 5.000000e-01 : f32
    %282 = vector.broadcast %cst_100 : f32 to vector<8x128xf32>
    %283 = arith.mulf %282, %281 : vector<8x128xf32>
    %284 = math.tanh %283 : vector<8x128xf32>
    %cst_101 = arith.constant 1.000000e+00 : f32
    %285 = vector.broadcast %cst_101 : f32 to vector<8x128xf32>
    %286 = arith.addf %284, %285 : vector<8x128xf32>
    %cst_102 = arith.constant 5.000000e-01 : f32
    %287 = vector.broadcast %cst_102 : f32 to vector<8x128xf32>
    %288 = arith.mulf %287, %286 : vector<8x128xf32>
    %289 = vector.extract_strided_slice %272 {offsets = [0, 256], sizes = [8, 128], strides = [1, 1]} : vector<8x512xf32> to vector<8x128xf32>
    %290 = math.tanh %289 : vector<8x128xf32>
    %291 = vector.extract_strided_slice %272 {offsets = [0, 384], sizes = [8, 128], strides = [1, 1]} : vector<8x512xf32> to vector<8x128xf32>
    %cst_103 = arith.constant 5.000000e-01 : f32
    %292 = vector.broadcast %cst_103 : f32 to vector<8x128xf32>
    %293 = arith.mulf %292, %291 : vector<8x128xf32>
    %294 = math.tanh %293 : vector<8x128xf32>
    %cst_104 = arith.constant 1.000000e+00 : f32
    %295 = vector.broadcast %cst_104 : f32 to vector<8x128xf32>
    %296 = arith.addf %294, %295 : vector<8x128xf32>
    %cst_105 = arith.constant 5.000000e-01 : f32
    %297 = vector.broadcast %cst_105 : f32 to vector<8x128xf32>
    %298 = arith.mulf %297, %296 : vector<8x128xf32>
    %299 = arith.mulf %288, %260 : vector<8x128xf32>
    %300 = arith.mulf %280, %290 : vector<8x128xf32>
    %301 = arith.addf %299, %300 : vector<8x128xf32>
    %302 = math.tanh %301 : vector<8x128xf32>
    %303 = arith.mulf %298, %302 : vector<8x128xf32>
    %304 = vector.broadcast %c6_i32 : i32 to vector<8x1xi32>
    %305 = arith.cmpi eq, %17, %304 : vector<8x1xi32>
    %306 = vector.shape_cast %305 : vector<8x1xi1> to vector<8x1xi1>
    %307 = vector.broadcast %306 : vector<8x1xi1> to vector<8x128xi1>
    %308 = arith.select %307, %303, %267 : vector<8x128xi1>, vector<8x128xf32>
    %c7_i32 = arith.constant 7 : i32
    %309 = arith.index_cast %c7_i32 : i32 to index
    %c0_106 = arith.constant 0 : index
    %c0_107 = arith.constant 0 : index
    %310 = vector.load %arg9[%309, %c0_106, %c0_107] : memref<8x8x512xf32, #tpu.memory_space<vmem>>, vector<1x8x512xf32>
    %311 = vector.shape_cast %310 : vector<1x8x512xf32> to vector<8x512xf32>
    %cst_108 = arith.constant dense<0.000000e+00> : vector<8x512xf32>
    %312 = tpu.matmul %303, %18, %cst_108 {dimension_numbers = #tpu.dot_dimension_numbers<[1], [0], [0], [1], [0, 0, 1, 1], [], []>} : vector<8x128xf32>, vector<128x512xf32>, vector<8x512xf32> -> vector<8x512xf32>
    %313 = arith.addf %311, %312 : vector<8x512xf32>
    %314 = vector.extract_strided_slice %313 {offsets = [0, 0], sizes = [8, 128], strides = [1, 1]} : vector<8x512xf32> to vector<8x128xf32>
    %cst_109 = arith.constant 5.000000e-01 : f32
    %315 = vector.broadcast %cst_109 : f32 to vector<8x128xf32>
    %316 = arith.mulf %315, %314 : vector<8x128xf32>
    %317 = math.tanh %316 : vector<8x128xf32>
    %cst_110 = arith.constant 1.000000e+00 : f32
    %318 = vector.broadcast %cst_110 : f32 to vector<8x128xf32>
    %319 = arith.addf %317, %318 : vector<8x128xf32>
    %cst_111 = arith.constant 5.000000e-01 : f32
    %320 = vector.broadcast %cst_111 : f32 to vector<8x128xf32>
    %321 = arith.mulf %320, %319 : vector<8x128xf32>
    %322 = vector.extract_strided_slice %313 {offsets = [0, 128], sizes = [8, 128], strides = [1, 1]} : vector<8x512xf32> to vector<8x128xf32>
    %cst_112 = arith.constant 5.000000e-01 : f32
    %323 = vector.broadcast %cst_112 : f32 to vector<8x128xf32>
    %324 = arith.mulf %323, %322 : vector<8x128xf32>
    %325 = math.tanh %324 : vector<8x128xf32>
    %cst_113 = arith.constant 1.000000e+00 : f32
    %326 = vector.broadcast %cst_113 : f32 to vector<8x128xf32>
    %327 = arith.addf %325, %326 : vector<8x128xf32>
    %cst_114 = arith.constant 5.000000e-01 : f32
    %328 = vector.broadcast %cst_114 : f32 to vector<8x128xf32>
    %329 = arith.mulf %328, %327 : vector<8x128xf32>
    %330 = vector.extract_strided_slice %313 {offsets = [0, 256], sizes = [8, 128], strides = [1, 1]} : vector<8x512xf32> to vector<8x128xf32>
    %331 = math.tanh %330 : vector<8x128xf32>
    %332 = vector.extract_strided_slice %313 {offsets = [0, 384], sizes = [8, 128], strides = [1, 1]} : vector<8x512xf32> to vector<8x128xf32>
    %cst_115 = arith.constant 5.000000e-01 : f32
    %333 = vector.broadcast %cst_115 : f32 to vector<8x128xf32>
    %334 = arith.mulf %333, %332 : vector<8x128xf32>
    %335 = math.tanh %334 : vector<8x128xf32>
    %cst_116 = arith.constant 1.000000e+00 : f32
    %336 = vector.broadcast %cst_116 : f32 to vector<8x128xf32>
    %337 = arith.addf %335, %336 : vector<8x128xf32>
    %cst_117 = arith.constant 5.000000e-01 : f32
    %338 = vector.broadcast %cst_117 : f32 to vector<8x128xf32>
    %339 = arith.mulf %338, %337 : vector<8x128xf32>
    %340 = arith.mulf %329, %301 : vector<8x128xf32>
    %341 = arith.mulf %321, %331 : vector<8x128xf32>
    %342 = arith.addf %340, %341 : vector<8x128xf32>
    %343 = math.tanh %342 : vector<8x128xf32>
    %344 = arith.mulf %339, %343 : vector<8x128xf32>
    %345 = vector.broadcast %c7_i32 : i32 to vector<8x1xi32>
    %346 = arith.cmpi eq, %17, %345 : vector<8x1xi32>
    %347 = vector.shape_cast %346 : vector<8x1xi1> to vector<8x1xi1>
    %348 = vector.broadcast %347 : vector<8x1xi1> to vector<8x128xi1>
    %349 = arith.select %348, %344, %308 : vector<8x128xi1>, vector<8x128xf32>
    %c8_i32 = arith.constant 8 : i32
    %c0_118 = arith.constant 0 : index
    %c0_119 = arith.constant 0 : index
    %350 = vector.load %arg8[%c0_118, %c0_119] : memref<8x128xf32, #tpu.memory_space<vmem>>, vector<8x128xf32>
    tpu.vector_store %arg8[%c0_118, %c0_119], %349 {strides = array<i32>} : memref<8x128xf32, #tpu.memory_space<vmem>>, vector<8x128xf32>,
    return
  }
}

</mosaic_0001>

<bundles_post_ra>
// kernel: tpu_custom_call.1
= control target key start
LH: loop header
LB: loop body
LE: loop exit
PB: predicated region body
PF: predicated region fallthrough
CT: control target
= control target key end

     0   :  { %13 = vsyncpa [#allocation4], 0  ;;  %s3505_s0 = inlined_call_operand.vmem [shape: f32[64,16], index: 0, kind: input, shape index: {}]   ;;  %s3506_s1 = inlined_call_operand.vmem [shape: f32[64,1], index: 1, kind: input, shape index: {}]   ;;  %s3507_s2 = inlined_call_operand.vmem [shape: s32[8,1], index: 2, kind: input, shape index: {}]   ;;  %s3508_s3 = inlined_call_operand.vmem [shape: f32[16,32], index: 3, kind: input, shape index: {}]   ;;  %s3509_s4 = inlined_call_operand.vmem [shape: f32[1,32], index: 4, kind: input, shape index: {}]   ;;  %s3510_s5 = inlined_call_operand.vmem [shape: f32[32,512], index: 5, kind: input, shape index: {}]   ;;  %s3511_s6 = inlined_call_operand.hbm [shape: f32[128,512], index: 6, kind: input, shape index: {}]   ;;  %s3512_s7 = inlined_call_operand.vmem [shape: f32[1,512], index: 7, kind: input, shape index: {}]   ;;  %s3513_s8 = inlined_call_operand.hbm [shape: f32[8,128], index: 8, kind: output, shape index: {}]  }
   0x1   :  { %14 = vsyncpa [#allocation5], 0  ;;  %s2331_s27 = smov [#allocation3]  }
   0x2   :  { %s32_s28 = sshll.u32 %s2331_s27, 4  ;;  %s33_s28 = int_to_ptr.vmem [resolvable:$true] %s32_s28 }
   0x3   :  { %s2295_s29 = scalar_lea.vmem %s33_s28, 8192  ;;  %p2300_p1 = scmp.lt.s32.totalorder %s33_s28, %s33_s28 }
   0x4   :  { %p2296_p0 = scmp.ne.s32.totalorder %s33_s28, %s2295_s29  ;;  %p2301_p2 = scmp.lt.s32.totalorder %s2295_s29, %s2295_s29 }
   0x6   :  { %p2302_p3 = por %p2301_p2, %p2300_p1 }
   0x8   :  { %p2303_p4 = pnand %p2302_p3, %p2296_p0 }
   0xa   :  { %2306 = shalt.err (!%p2303_p4)
}
   0xb   :  { %s2332_s30 = smov 512   ;;  %s2333_s9 = smov 32  }
   0xc   :  { %38 = dma.hbm_to_vmem [thread:$0]  %s3511_s6, 8192, %s33_s28, [#allocation4], %s2332_s30, %s2332_s30, %s2333_s9  }
   0xd   :  { %2327 = dma.done.wait [#allocation4], 8192  }
   0xe   :  { %2328 = vsyncadd [#allocation4], 4294959104  ;;  %v2334_v0 = vmov 0   ;;  %v53_v1 = vld [vmem:[%s3508_s3 + $0x8] sm:$0xff]  ;;  %v52_v2 = vld [vmem:[%s3508_s3] sm:$0xff]  ;;  %vm61_vm0 = vcmask 130048  }
   0xf   :  { %2125 = vset.pattern.permute.xlu0 %v2334_v0  ;;  %2126 = vset.pattern.permute.xlu1 %v2334_v0  ;;  %v44_v3 = vld [vmem:[%s3505_s0] sm:$0xff]  ;;  %v45_v5 = vld [vmem:[%s3505_s0 + $0x8] sm:$0xff]  ;;  %v50_v7 = vld [vmem:[%s3505_s0 + $0x30] sm:$0xff]  ;;  %v3516_v44 = vmov 0.0   ;;  %vm293_vm9 = vcmask 261120  }
  0x10   :  { %2099 = vmatprep.subr.mxu0 %v53_v1  ;;  %2115 = vmatprep.subr.mxu1 %v53_v1  ;;  %v48_v4 = vld [vmem:[%s3505_s0 + $0x20] sm:$0xff]  ;;  %v49_v6 = vld [vmem:[%s3505_s0 + $0x28] sm:$0xff]  ;;  %v46_v8 = vld [vmem:[%s3505_s0 + $0x10] sm:$0xff] }
  0x11   :  { %2100 = vmatpush3.msra.mxu0 %v53_v1  ;;  %2117 = vmatpush3.msra.mxu1 %v53_v1  ;;  %v199_v9 = vld [vmem:[%s3506_s1] sm:$0xff]  ;;  %v201_v10 = vld [vmem:[%s3506_s1 + $0x10] sm:$0xff]  ;;  %v51_v11 = vld [vmem:[%s3505_s0 + $0x38] sm:$0xff] }
  0x12   :  { %2101 = vmatprep.subr.mxu0 %v52_v2  ;;  %2116 = vmatprep.subr.mxu1 %v52_v2  ;;  %v47_v12 = vld [vmem:[%s3505_s0 + $0x18] sm:$0xff]  ;;  %v200_v13 = vld [vmem:[%s3506_s1 + $0x8] sm:$0xff]  ;;  %v203_v15 = vld [vmem:[%s3506_s1 + $0x20] sm:$0xff] }
  0x13   :  { %2102 = vmatpush3.msra.mxu0 %v52_v2  ;;  %2118 = vmatpush3.msra.mxu1 %v52_v2  ;;  %v202_v14 = vld [vmem:[%s3506_s1 + $0x18] sm:$0xff]  ;;  %v204_v16 = vld [vmem:[%s3506_s1 + $0x28] sm:$0xff]  ;;  %v576_v17 = vld [vmem:[%s3507_s2] sm:$0xff] }
  0x14   :  { %2103 = vmatprep.mubr.msk.f32.mxu0 %vm61_vm0, %v44_v3  ;;  %2109 = vmatprep.mubr.msk.f32.mxu1 %vm61_vm0, %v48_v4  ;;  %v205_v18 = vld [vmem:[%s3506_s1 + $0x30] sm:$0xff]  ;;  %v206_v19 = vld [vmem:[%s3506_s1 + $0x38] sm:$0xff]  ;;  %vm809_vm1 = vcmp.eq.s32.totalorder %v576_v17, 0  ;;  %vm985_vm2 = vcmp.eq.s32.totalorder %v576_v17, 1  ;;  %vm1161_vm3 = vcmp.eq.s32.totalorder %v576_v17, 2  ;;  %vm1337_vm4 = vcmp.eq.s32.totalorder %v576_v17, 3 }
  0x15   :  { %2104 = vmatmul.mubr.msk.f32.vlgmr.msra.gmra.mxu0 %vm61_vm0, %v45_v5  ;;  %2110 = vmatmul.mubr.msk.f32.vlgmr.msra.gmra.mxu1 %vm61_vm0, %v49_v6  ;;  %v810_v20 = vsel %vm809_vm1, 1, %v2334_v0  ;;  %v986_v21 = vsel %vm985_vm2, 1, %v2334_v0  ;;  %v1162_v22 = vsel %vm1161_vm3, 1, %v2334_v0  ;;  %v1338_v23 = vsel %vm1337_vm4, 1, %v2334_v0  ;;  %v268_v28 = vld [vmem:[%s3510_s5 + $0x68] sm:$0xff]  ;;  %v270_v29 = vld [vmem:[%s3510_s5 + $0x78] sm:$0xff] }
  0x16   :  { %2112 = vmatprep.mubr.msk.f32.mxu1 %vm61_vm0, %v50_v7  ;;  %2106 = vmatprep.mubr.msk.f32.mxu0 %vm61_vm0, %v46_v8  ;;  %vm1513_vm5 = vcmp.eq.s32.totalorder %v576_v17, 4  ;;  %vm1689_vm6 = vcmp.eq.s32.totalorder %v576_v17, 5  ;;  %vm1865_vm7 = vcmp.eq.s32.totalorder %v576_v17, 6  ;;  %vm2041_vm8 = vcmp.eq.s32.totalorder %v576_v17, 7  ;;  %v267_v30 = vld [vmem:[%s3510_s5 + $0x60] sm:$0xff]  ;;  %v269_v31 = vld [vmem:[%s3510_s5 + $0x70] sm:$0xff] }
  0x17   :  { %209 = vperm.xlu0 %2125, %v199_v9   ;;  %219 = vperm.xlu1 %2126, %v201_v10   ;;  %v1514_v24 = vsel %vm1513_vm5, 1, %v2334_v0  ;;  %v1690_v25 = vsel %vm1689_vm6, 1, %v2334_v0  ;;  %v1866_v26 = vsel %vm1865_vm7, 1, %v2334_v0  ;;  %v2042_v27 = vsel %vm2041_vm8, 1, %v2334_v0  ;;  %v264_v32 = vld [vmem:[%s3510_s5 + $0x48] sm:$0xff]  ;;  %v266_v33 = vld [vmem:[%s3510_s5 + $0x58] sm:$0xff] }
  0x18   :  { %342 = vmatprep.subr.mxu1 %v268_v28  ;;  %455 = vmatprep.subr.mxu0 %v270_v29  ;;  %v263_v34 = vld [vmem:[%s3510_s5 + $0x40] sm:$0xff]  ;;  %v265_v35 = vld [vmem:[%s3510_s5 + $0x50] sm:$0xff]  ;;  %v260_v36 = vld [vmem:[%s3510_s5 + $0x28] sm:$0xff] }
  0x19   :  { %2113 = vmatmul.mubr.msk.f32.gmra.mxu1 %vm61_vm0, %v51_v11  ;;  %2107 = vmatmul.mubr.msk.f32.gmra.mxu0 %vm61_vm0, %v47_v12  ;;  %v262_v37 = vld [vmem:[%s3510_s5 + $0x38] sm:$0xff]  ;;  %v259_v38 = vld [vmem:[%s3510_s5 + $0x20] sm:$0xff]  ;;  %v261_v39 = vld [vmem:[%s3510_s5 + $0x30] sm:$0xff] }
  0x1a   :  { %343 = vmatpush1.msra.mxu1 %v267_v30  ;;  %456 = vmatpush1.msra.mxu0 %v269_v31  ;;  %v256_v40 = vld [vmem:[%s3510_s5 + $0x8] sm:$0xff]  ;;  %v258_v41 = vld [vmem:[%s3510_s5 + $0x18] sm:$0xff]  ;;  %v255_v42 = vld [vmem:[%s3510_s5] sm:$0xff] }
  0x1b   :  { %214 = vperm.xlu0 %2125, %v200_v13   ;;  %224 = vperm.xlu1 %2126, %v202_v14   ;;  %v257_v43 = vld [vmem:[%s3510_s5 + $0x10] sm:$0xff]  ;;  %v2509_v45 = vld [vmem:[#allocation3 + $0x1e8] sm:$0xff]  ;;  %v2511_v46 = vld [vmem:[#allocation3 + $0x1f8] sm:$0xff] }
  0x1c   :  { %344 = vmatprep.subr.mxu1 %v264_v32  ;;  %457 = vmatprep.subr.mxu0 %v266_v33  ;;  %3610 = vst [vmem:[#allocation9_spill] sm:$0xff] %v2509_v45  ;;  %3611 = vst [vmem:[#allocation10_spill] sm:$0xff] %v2511_v46  ;;  %v2519_v48 = vld [vmem:[%s3509_s4] ss:$0 sm:$0xff]  ;;  %v2527_v62 = vld [vmem:[#allocation3 + $0x1f0] sm:$0xff] }
  0x1d   :  { %345 = vmatpush1.msra.mxu1 %v263_v34  ;;  %458 = vmatpush1.msra.mxu0 %v265_v35  ;;  %v2525_v61 = vld [vmem:[#allocation3 + $0x1e0] sm:$0xff]  ;;  %v2529_v63 = vld [vmem:[#allocation3 + $0x1c8] sm:$0xff]  ;;  %v2531_v0 = vld [vmem:[#allocation3 + $0x1d8] sm:$0xff] }
  0x1e   :  { %346 = vmatprep.subr.mxu1 %v260_v36  ;;  %459 = vmatprep.subr.mxu0 %v262_v37  ;;  %v2535_v2 = vld [vmem:[#allocation3 + $0x1c0] sm:$0xff]  ;;  %v2540_v4 = vld [vmem:[#allocation3 + $0x1a8] sm:$0xff]  ;;  %v2544_v6 = vld [vmem:[#allocation3 + $0x1d0] sm:$0xff] }
  0x1f   :  { %229 = vperm.xlu0 %2125, %v203_v15   ;;  %234 = vperm.xlu1 %2126, %v204_v16   ;;  %v2548_v8 = vld [vmem:[#allocation3 + $0x1a0] sm:$0xff]  ;;  %v2552_v9 = vld [vmem:[#allocation3 + $0x1b8] sm:$0xff]  ;;  %v2554_v10 = vld [vmem:[#allocation3 + $0x188] sm:$0xff] }
  0x20   :  { %347 = vmatpush1.msra.mxu1 %v259_v38  ;;  %460 = vmatpush1.msra.mxu0 %v261_v39  ;;  %v2558_v11 = vld [vmem:[#allocation3 + $0x1b0] sm:$0xff]  ;;  %v2560_v12 = vld [vmem:[#allocation3 + $0x180] sm:$0xff]  ;;  %v2564_v15 = vld [vmem:[#allocation3 + $0x198] sm:$0xff] }
  0x21   :  { %348 = vmatprep.subr.mxu1 %v256_v40  ;;  %461 = vmatprep.subr.mxu0 %v258_v41  ;;  %v2569_v17 = vld [vmem:[#allocation3 + $0x168] sm:$0xff]  ;;  %v2593_v28 = vld [vmem:[#allocation3 + $0x158] sm:$0xff]  ;;  %v2602_v32 = vld [vmem:[#allocation3 + $0x150] sm:$0xff] }
  0x22   :  { %349 = vmatpush1.msra.mxu1 %v255_v42  ;;  %382 = vmatprep.mubr.f32.mxu1 %v3516_v44  ;;  %v2598_v30 = vld [vmem:[#allocation3 + $0x128] sm:$0xff]  ;;  %v2606_v34 = vld [vmem:[#allocation3 + $0x120] sm:$0xff]  ;;  %v2610_v35 = vld [vmem:[#allocation3 + $0x138] sm:$0xff] }
  0x23   :  { %239 = vperm.xlu0 %2125, %v205_v18   ;;  %244 = vperm.xlu1 %2126, %v206_v19   ;;  %v2573_v19 = vld [vmem:[#allocation3 + $0x190] sm:$0xff]  ;;  %v2612_v36 = vld [vmem:[#allocation3 + $0x108] sm:$0xff]  ;;  %v2618_v38 = vld [vmem:[#allocation3 + $0x100] sm:$0xff] }
  0x24   :  { %462 = vmatpush1.msra.mxu0 %v257_v43  ;;  %495 = vmatprep.mubr.f32.mxu0 %v3516_v44  ;;  %v2616_v37 = vld [vmem:[#allocation3 + $0x130] sm:$0xff]  ;;  %v2622_v40 = vld [vmem:[#allocation3 + $0x118] sm:$0xff]  ;;  %v2627_v42 = vld [vmem:[#allocation3 + $0xe8] sm:$0xff] }
  0x25   :  { %645 = vmatprep.subr.mxu1 %v2509_v45  ;;  %716 = vmatprep.subr.mxu0 %v2511_v46 }
  0x27   :  { %812 = vperm.xlu0 %2125, %v810_v20   ;;  %988 = vperm.xlu1 %2126, %v986_v21   ;;  %v2577_v21 = vld [vmem:[#allocation3 + $0x160] sm:$0xff] }
  0x2b   :  { %1164 = vperm.xlu0 %2125, %v1162_v22   ;;  %1340 = vperm.xlu1 %2126, %v1338_v23   ;;  %v2581_v23 = vld [vmem:[#allocation3 + $0x178] sm:$0xff] }
  0x2f   :  { %1516 = vperm.xlu0 %2125, %v1514_v24   ;;  %1692 = vperm.xlu1 %2126, %v1690_v25   ;;  %v2583_v24 = vld [vmem:[#allocation3 + $0x148] sm:$0xff]  ;;  %v2587_v25 = vld [vmem:[#allocation3 + $0x170] sm:$0xff] }
  0x33   :  { %1868 = vperm.xlu0 %2125, %v1866_v26   ;;  %2044 = vperm.xlu1 %2126, %v2042_v27   ;;  %v2589_v26 = vld [vmem:[#allocation3 + $0x140] sm:$0xff] }
  0x92   :  { %v210_v57 = vpop.permute.xlu0 %209  ;;  %v220_v18 = vpop.permute.xlu1 %219 }
  0x96   :  { %v215_v5 = vpop.permute.xlu0 %214  ;;  %v225_v31 = vpop.permute.xlu1 %224 }
  0x9a   :  { %v230_v43 = vpop.permute.xlu0 %229 }
  0xd5   :  { %v2105_v47 = vpop.f32.mrf.mxu0  ;;  %v2111_v55 = vpop.f32.mrf.mxu1 }
  0xd6   :  { %v158_v51 = vadd.f32 %v2105_v47, %v2519_v48  ;;  %v178_v16 = vadd.f32 %v2111_v55, %v2519_v48  ;;  %v2631_v47 = vld [vmem:[#allocation3 + $0x110] sm:$0xff]  ;;  %v2651_v55 = vld [vmem:[#allocation3 + $0xd8] sm:$0xff] }
  0xd7   :  { %v152_v49 = vpop.f32.mrf.mxu0  ;;  %v172_v60 = vpop.f32.mrf.mxu1 }
  0xd8   :  { %v153_v50 = vadd.f32 %v2519_v48, %v152_v49  ;;  %v173_v3 = vadd.f32 %v2519_v48, %v172_v60  ;;  %v2663_v60 = vld [vmem:[#allocation3 + $0xa0] sm:$0xff] }
  0xd9   :  { %v2108_v52 = vpop.f32.mrf.mxu0  ;;  %v2114_v14 = vpop.f32.mrf.mxu1 }
  0xda   :  { %2127 = vtanh.f32 %v153_v50  ;;  %v168_v56 = vadd.f32 %v2108_v52, %v2519_v48  ;;  %v188_v41 = vadd.f32 %v2114_v14, %v2519_v48  ;;  %v2635_v50 = vld [vmem:[#allocation3 + $0xe0] sm:$0xff]  ;;  %v2645_v52 = vld [vmem:[#allocation3 + $0xf0] sm:$0xff]  ;;  %v2679_v14 = vld [vmem:[#allocation3 + $0x98] sm:$0xff] }
  0xdb   :  { %v162_v53 = vpop.f32.mrf.mxu0  ;;  %2129 = vtanh.f32 %v158_v51  ;;  %v182_v22 = vpop.f32.mrf.mxu1  ;;  %v2641_v51 = vld [vmem:[#allocation3 + $0xc8] sm:$0xff]  ;;  %3614 = vst [vmem:[#allocation13_spill] sm:$0xff] %v2679_v14 }
  0xdc   :  { %v163_v54 = vadd.f32 %v2519_v48, %v162_v53  ;;  %v183_v29 = vadd.f32 %v2519_v48, %v182_v22  ;;  %v2639_v48 = vld [vmem:[#allocation3 + $0xf8] sm:$0xff]  ;;  %v2647_v53 = vld [vmem:[#allocation3 + $0xc0] sm:$0xff] }
  0xde   :  { %2131 = vtanh.f32 %v163_v54 }
  0xdf   :  { %2133 = vtanh.f32 %v168_v56  ;;  %v2655_v56 = vld [vmem:[#allocation3 + $0xa8] sm:$0xff] }
  0xe0   :  { %2135 = vtanh.f32 %v173_v3  ;;  %v2669_v3 = vld [vmem:[#allocation3 + $0x88] sm:$0xff] }
  0xe1   :  { %2137 = vtanh.f32 %v178_v16  ;;  %3612 = vst [vmem:[#allocation11_spill] sm:$0xff] %v2669_v3  ;;  %v2683_v16 = vld [vmem:[#allocation3 + $0x68] sm:$0xff] }
  0xe2   :  { %2139 = vtanh.f32 %v183_v29  ;;  %3615 = vst [vmem:[#allocation14_spill] sm:$0xff] %v2683_v16  ;;  %v2695_v29 = vld [vmem:[#allocation3 + $0x78] sm:$0xff] }
  0xe3   :  { %2141 = vtanh.f32 %v188_v41  ;;  %3618 = vst [vmem:[#allocation17_spill] sm:$0xff] %v2695_v29 }
  0xe7   :  { %v2128_v58 = vpop.eup %2127 }
  0xe8   :  { %v247_v59 = vmul.f32 %v2128_v58, %v210_v57  ;;  %v2130_v1 = vpop.eup %2129  ;;  %v235_v57 = vpop.permute.xlu1 %234  ;;  %v2659_v58 = vld [vmem:[#allocation3 + $0xd0] sm:$0xff] }
  0xe9   :  { %v248_v7 = vmul.f32 %v2130_v1, %v215_v5  ;;  %v2667_v1 = vld [vmem:[#allocation3 + $0xb8] sm:$0xff]  ;;  %v2673_v5 = vld [vmem:[#allocation3 + $0xb0] sm:$0xff] }
  0xea   :  { %2073 = vmatmul.mubr.msk.f32.vlgmr.msra.gmra.mxu1 %vm293_vm9, %v247_v59  ;;  %2081 = vmatmul.mubr.msk.f32.vlgmr.msra.gmra.mxu0 %vm293_vm9, %v247_v59 }
  0xeb   :  { %646 = vmatpush1.msra.mxu1 %v2525_v61  ;;  %717 = vmatpush1.msra.mxu0 %v2527_v62  ;;  %v2132_v13 = vpop.eup %2131 }
  0xec   :  { %647 = vmatprep.subr.mxu1 %v2529_v63  ;;  %718 = vmatprep.subr.mxu0 %v2531_v0  ;;  %v249_v20 = vmul.f32 %v2132_v13, %v220_v18  ;;  %v2134_v27 = vpop.eup %2133  ;;  %v240_v18 = vpop.permute.xlu0 %239 }
  0xed   :  { %648 = vmatpush1.msra.mxu1 %v2535_v2  ;;  %388 = vmatprep.mubr.f32.mxu1 %v3516_v44  ;;  %v250_v33 = vmul.f32 %v2134_v27, %v225_v31  ;;  %v2136_v39 = vpop.eup %2135  ;;  %v2691_v27 = vld [vmem:[#allocation3 + $0x60] sm:$0xff]  ;;  %v2697_v31 = vld [vmem:[#allocation3 + $0x48] sm:$0xff] }
  0xee   :  { %501 = vmatprep.mubr.f32.mxu0 %v3516_v44  ;;  %649 = vmatprep.subr.mxu1 %v2540_v4  ;;  %v251_v49 = vmul.f32 %v2136_v39, %v230_v43  ;;  %v2138_v54 = vpop.eup %2137  ;;  %3617 = vst [vmem:[#allocation16_spill] sm:$0xff] %v2691_v27  ;;  %3619 = vst [vmem:[#allocation18_spill] sm:$0xff] %v2697_v31  ;;  %v2703_v39 = vld [vmem:[#allocation3 + $0x40] sm:$0xff]  ;;  %v2707_v43 = vld [vmem:[#allocation3 + $0x58] sm:$0xff] }
  0xef   :  { %719 = vmatpush1.msra.mxu0 %v2544_v6  ;;  %2074 = vmatmul.mubr.msk.f32.gmra.mxu1 %vm293_vm9, %v248_v7  ;;  %v252_v59 = vmul.f32 %v2138_v54, %v235_v57  ;;  %v2140_v13 = vpop.eup %2139  ;;  %3621 = vst [vmem:[#allocation20_spill] sm:$0xff] %v2703_v39  ;;  %3622 = vst [vmem:[#allocation21_spill] sm:$0xff] %v2707_v43  ;;  %v245_v54 = vpop.permute.xlu1 %244  ;;  %v2715_v57 = vld [vmem:[#allocation3 + $0x50] sm:$0xff] }
  0xf0   :  { %2082 = vmatmul.mubr.msk.f32.gmra.mxu0 %vm293_vm9, %v248_v7  ;;  %650 = vmatpush1.msra.mxu1 %v2548_v8  ;;  %v2675_v7 = vld [vmem:[#allocation3 + $0x80] sm:$0xff]  ;;  %v253_v22 = vmul.f32 %v2140_v13, %v240_v18  ;;  %v2142_v41 = vpop.eup %2141  ;;  %3624 = vst [vmem:[#allocation23_spill] sm:$0xff] %v2715_v57  ;;  %v2723_v18 = vld [vmem:[#allocation3 + $0x38] sm:$0xff] }
  0xf1   :  { %720 = vmatprep.subr.mxu0 %v2552_v9  ;;  %651 = vmatprep.subr.mxu1 %v2554_v10  ;;  %3613 = vst [vmem:[#allocation12_spill] sm:$0xff] %v2675_v7  ;;  %v2719_v13 = vld [vmem:[#allocation3 + $0x20] sm:$0xff]  ;;  %3626 = vst [vmem:[#allocation25_spill] sm:$0xff] %v2723_v18 }
  0xf2   :  { %721 = vmatpush1.msra.mxu0 %v2558_v11  ;;  %652 = vmatpush1.msra.mxu1 %v2560_v12  ;;  %3625 = vst [vmem:[#allocation24_spill] sm:$0xff] %v2719_v13 }
  0xf3   :  { %722 = vmatprep.subr.mxu0 %v2564_v15  ;;  %394 = vmatprep.mubr.f32.mxu1 %v3516_v44 }
  0xf4   :  { %507 = vmatprep.mubr.f32.mxu0 %v3516_v44  ;;  %653 = vmatprep.subr.mxu1 %v2569_v17 }
  0xf5   :  { %723 = vmatpush1.msra.mxu0 %v2573_v19  ;;  %2075 = vmatmul.mubr.msk.f32.gmra.mxu1 %vm293_vm9, %v249_v20 }
  0xf6   :  { %2083 = vmatmul.mubr.msk.f32.gmra.mxu0 %vm293_vm9, %v249_v20  ;;  %654 = vmatpush1.msra.mxu1 %v2577_v21  ;;  %v2687_v20 = vld [vmem:[#allocation3 + $0x90] sm:$0xff] }
  0xf7   :  { %724 = vmatprep.subr.mxu0 %v2581_v23  ;;  %655 = vmatprep.subr.mxu1 %v2583_v24  ;;  %3616 = vst [vmem:[#allocation15_spill] sm:$0xff] %v2687_v20 }
  0xf8   :  { %725 = vmatpush1.msra.mxu0 %v2587_v25  ;;  %656 = vmatpush1.msra.mxu1 %v2589_v26 }
  0xf9   :  { %726 = vmatprep.subr.mxu0 %v2593_v28  ;;  %400 = vmatprep.mubr.f32.mxu1 %v3516_v44 }
  0xfa   :  { %513 = vmatprep.mubr.f32.mxu0 %v3516_v44  ;;  %657 = vmatprep.subr.mxu1 %v2598_v30 }
  0xfb   :  { %727 = vmatpush1.msra.mxu0 %v2602_v32  ;;  %2076 = vmatmul.mubr.msk.f32.gmra.mxu1 %vm293_vm9, %v250_v33 }
  0xfc   :  { %2084 = vmatmul.mubr.msk.f32.gmra.mxu0 %vm293_vm9, %v250_v33  ;;  %658 = vmatpush1.msra.mxu1 %v2606_v34  ;;  %v2701_v33 = vld [vmem:[#allocation3 + $0x70] sm:$0xff] }
  0xfd   :  { %728 = vmatprep.subr.mxu0 %v2610_v35  ;;  %659 = vmatprep.subr.mxu1 %v2612_v36  ;;  %3620 = vst [vmem:[#allocation19_spill] sm:$0xff] %v2701_v33 }
  0xfe   :  { %729 = vmatpush1.msra.mxu0 %v2616_v37  ;;  %660 = vmatpush1.msra.mxu1 %v2618_v38 }
  0xff   :  { %730 = vmatprep.subr.mxu0 %v2622_v40  ;;  %406 = vmatprep.mubr.f32.mxu1 %v3516_v44 }
 0x100   :  { %519 = vmatprep.mubr.f32.mxu0 %v3516_v44  ;;  %661 = vmatprep.subr.mxu1 %v2627_v42 }
 0x101   :  { %731 = vmatpush1.msra.mxu0 %v2631_v47  ;;  %2077 = vmatmul.mubr.msk.f32.gmra.mxu1 %vm293_vm9, %v251_v49 }
 0x102   :  { %2085 = vmatmul.mubr.msk.f32.gmra.mxu0 %vm293_vm9, %v251_v49  ;;  %662 = vmatpush1.msra.mxu1 %v2635_v50  ;;  %v2711_v49 = vld [vmem:[#allocation3 + $0x28] sm:$0xff] }
 0x103   :  { %732 = vmatprep.subr.mxu0 %v2639_v48  ;;  %663 = vmatprep.subr.mxu1 %v2641_v51  ;;  %3623 = vst [vmem:[#allocation22_spill] sm:$0xff] %v2711_v49 }
 0x104   :  { %733 = vmatpush1.msra.mxu0 %v2645_v52  ;;  %664 = vmatpush1.msra.mxu1 %v2647_v53 }
 0x105   :  { %734 = vmatprep.subr.mxu0 %v2651_v55  ;;  %412 = vmatprep.mubr.f32.mxu1 %v3516_v44 }
 0x106   :  { %525 = vmatprep.mubr.f32.mxu0 %v3516_v44  ;;  %665 = vmatprep.subr.mxu1 %v2655_v56 }
 0x107   :  { %735 = vmatpush1.msra.mxu0 %v2659_v58  ;;  %2078 = vmatmul.mubr.msk.f32.gmra.mxu1 %vm293_vm9, %v252_v59 }
 0x108   :  { %2086 = vmatmul.mubr.msk.f32.gmra.mxu0 %vm293_vm9, %v252_v59  ;;  %666 = vmatpush1.msra.mxu1 %v2663_v60  ;;  %v254_v59 = vmul.f32 %v2142_v41, %v245_v54  ;;  %v2731_v41 = vld [vmem:[#allocation3] sm:$0xff]  ;;  %v2735_v54 = vld [vmem:[#allocation3 + $0x18] sm:$0xff] }
 0x109   :  { %736 = vmatprep.subr.mxu0 %v2667_v1  ;;  %667 = vmatprep.subr.mxu1 %v2669_v3  ;;  %3629 = vst [vmem:[#allocation28_spill] sm:$0xff] %v2731_v41  ;;  %3630 = vst [vmem:[#allocation29_spill] sm:$0xff] %v2735_v54 }
 0x10a   :  { %737 = vmatpush1.msra.mxu0 %v2673_v5  ;;  %668 = vmatpush1.msra.mxu1 %v2675_v7 }
 0x10b   :  { %738 = vmatprep.subr.mxu0 %v2679_v14  ;;  %418 = vmatprep.mubr.f32.mxu1 %v3516_v44 }
 0x10c   :  { %531 = vmatprep.mubr.f32.mxu0 %v3516_v44  ;;  %669 = vmatprep.subr.mxu1 %v2683_v16 }
 0x10d   :  { %739 = vmatpush1.msra.mxu0 %v2687_v20  ;;  %2079 = vmatmul.mubr.msk.f32.gmra.mxu1 %vm293_vm9, %v253_v22 }
 0x10e   :  { %2087 = vmatmul.mubr.msk.f32.gmra.mxu0 %vm293_vm9, %v253_v22  ;;  %670 = vmatpush1.msra.mxu1 %v2691_v27  ;;  %v2725_v22 = vld [vmem:[#allocation3 + $0x8] sm:$0xff] }
 0x10f   :  { %740 = vmatprep.subr.mxu0 %v2695_v29  ;;  %671 = vmatprep.subr.mxu1 %v2697_v31  ;;  %3627 = vst [vmem:[#allocation26_spill] sm:$0xff] %v2725_v22 }
 0x110   :  { %741 = vmatpush1.msra.mxu0 %v2701_v33  ;;  %672 = vmatpush1.msra.mxu1 %v2703_v39  ;;  %v2729_v39 = vld [vmem:[#allocation3 + $0x30] sm:$0xff] }
 0x111   :  { %742 = vmatprep.subr.mxu0 %v2707_v43  ;;  %424 = vmatprep.mubr.f32.mxu1 %v3516_v44  ;;  %3628 = vst [vmem:[#allocation27_spill] sm:$0xff] %v2729_v39 }
 0x112   :  { %537 = vmatprep.mubr.f32.mxu0 %v3516_v44  ;;  %673 = vmatprep.subr.mxu1 %v2711_v49  ;;  %v2739_v44 = vld [vmem:[#allocation3 + $0x10] sm:$0xff]  ;;  %v3632_v49 = vmov 0.0  }
 0x113   :  { %743 = vmatpush1.msra.mxu0 %v2715_v57  ;;  %2080 = vmatmul.mubr.msk.f32.gmra.mxu1 %vm293_vm9, %v254_v59  ;;  %3631 = vst [vmem:[#allocation30_spill] sm:$0xff] %v2739_v44 }
 0x114   :  { %2088 = vmatmul.mubr.msk.f32.gmra.mxu0 %vm293_vm9, %v254_v59  ;;  %674 = vmatpush1.msra.mxu1 %v2719_v13  ;;  %v3633_v59 = vld [vmem:[#allocation20_spill] sm:$0xff] }
 0x115   :  { %744 = vmatprep.subr.mxu0 %v2723_v18  ;;  %675 = vmatprep.subr.mxu1 %v2725_v22 }
 0x116   :  { %745 = vmatpush1.msra.mxu0 %v2729_v39  ;;  %676 = vmatpush1.msra.mxu1 %v2731_v41 }
 0x117   :  { %746 = vmatprep.subr.mxu0 %v2735_v54  ;;  %709 = vmatprep.mubr.f32.mxu1 %v3632_v49 }
 0x118   :  { %747 = vmatpush1.msra.mxu0 %v2739_v44  ;;  %780 = vmatprep.mubr.f32.mxu0 %v3632_v49 }
 0x119   :  { %710 = vmatmul.mubr.f32.vlgmr.msra.gmra.mxu1 %v3632_v49  ;;  %781 = vmatmul.mubr.f32.vlgmr.msra.gmra.mxu0 %v3632_v49 }
 0x11a   :  { %821 = vmatprep.subr.mxu1 %v2509_v45  ;;  %892 = vmatprep.subr.mxu0 %v2511_v46 }
 0x11b   :  { %822 = vmatpush1.msra.mxu1 %v2525_v61  ;;  %893 = vmatpush1.msra.mxu0 %v2527_v62 }
 0x11c   :  { %823 = vmatprep.subr.mxu1 %v2529_v63  ;;  %894 = vmatprep.subr.mxu0 %v2531_v0 }
 0x11d   :  { %824 = vmatpush1.msra.mxu1 %v2535_v2  ;;  %895 = vmatpush1.msra.mxu0 %v2544_v6 }
 0x11e   :  { %825 = vmatprep.subr.mxu1 %v2540_v4  ;;  %896 = vmatprep.subr.mxu0 %v2552_v9 }
 0x11f   :  { %826 = vmatpush1.msra.mxu1 %v2548_v8  ;;  %897 = vmatpush1.msra.mxu0 %v2558_v11 }
 0x120   :  { %827 = vmatprep.subr.mxu1 %v2554_v10  ;;  %898 = vmatprep.subr.mxu0 %v2564_v15 }
 0x121   :  { %828 = vmatpush1.msra.mxu1 %v2560_v12  ;;  %899 = vmatpush1.msra.mxu0 %v2573_v19 }
 0x122   :  { %829 = vmatprep.subr.mxu1 %v2569_v17  ;;  %900 = vmatprep.subr.mxu0 %v2581_v23 }
 0x123   :  { %830 = vmatpush1.msra.mxu1 %v2577_v21  ;;  %901 = vmatpush1.msra.mxu0 %v2587_v25 }
 0x124   :  { %831 = vmatprep.subr.mxu1 %v2583_v24  ;;  %902 = vmatprep.subr.mxu0 %v2593_v28 }
 0x125   :  { %832 = vmatpush1.msra.mxu1 %v2589_v26  ;;  %903 = vmatpush1.msra.mxu0 %v2602_v32 }
 0x126   :  { %833 = vmatprep.subr.mxu1 %v2598_v30  ;;  %904 = vmatprep.subr.mxu0 %v2610_v35 }
 0x127   :  { %834 = vmatpush1.msra.mxu1 %v2606_v34  ;;  %905 = vmatpush1.msra.mxu0 %v2616_v37 }
 0x128   :  { %835 = vmatprep.subr.mxu1 %v2612_v36  ;;  %906 = vmatprep.subr.mxu0 %v2622_v40 }
 0x129   :  { %836 = vmatpush1.msra.mxu1 %v2618_v38  ;;  %907 = vmatpush1.msra.mxu0 %v2631_v47 }
 0x12a   :  { %837 = vmatprep.subr.mxu1 %v2627_v42  ;;  %908 = vmatprep.subr.mxu0 %v2639_v48 }
 0x12b   :  { %838 = vmatpush1.msra.mxu1 %v2635_v50  ;;  %909 = vmatpush1.msra.mxu0 %v2645_v52 }
 0x12c   :  { %839 = vmatprep.subr.mxu1 %v2641_v51  ;;  %910 = vmatprep.subr.mxu0 %v2651_v55 }
 0x12d   :  { %840 = vmatpush1.msra.mxu1 %v2647_v53  ;;  %911 = vmatpush1.msra.mxu0 %v2659_v58 }
 0x12e   :  { %841 = vmatprep.subr.mxu1 %v2655_v56  ;;  %912 = vmatprep.subr.mxu0 %v2667_v1 }
 0x12f   :  { %842 = vmatpush1.msra.mxu1 %v2663_v60  ;;  %913 = vmatpush1.msra.mxu0 %v2673_v5 }
 0x130   :  { %843 = vmatprep.subr.mxu1 %v2669_v3  ;;  %914 = vmatprep.subr.mxu0 %v2679_v14  ;;  %v3634_v14 = vld [vmem:[#allocation22_spill] sm:$0xff] }
 0x131   :  { %844 = vmatpush1.msra.mxu1 %v2675_v7  ;;  %915 = vmatpush1.msra.mxu0 %v2687_v20 }
 0x132   :  { %845 = vmatprep.subr.mxu1 %v2683_v16  ;;  %916 = vmatprep.subr.mxu0 %v2695_v29 }
 0x133   :  { %846 = vmatpush1.msra.mxu1 %v2691_v27  ;;  %917 = vmatpush1.msra.mxu0 %v2701_v33 }
 0x134   :  { %847 = vmatprep.subr.mxu1 %v2697_v31  ;;  %918 = vmatprep.subr.mxu0 %v2707_v43 }
 0x135   :  { %848 = vmatpush1.msra.mxu1 %v3633_v59  ;;  %919 = vmatpush1.msra.mxu0 %v2715_v57 }
 0x136   :  { %849 = vmatprep.subr.mxu1 %v3634_v14  ;;  %920 = vmatprep.subr.mxu0 %v2723_v18  ;;  %v273_v18 = vlaneseq }
 0x137   :  { %850 = vmatpush1.msra.mxu1 %v2719_v13  ;;  %921 = vmatpush1.msra.mxu0 %v2729_v39 }
 0x138   :  { %851 = vmatprep.subr.mxu1 %v2725_v22  ;;  %922 = vmatprep.subr.mxu0 %v2735_v54  ;;  %v274_v13 = vshrl.u32 %v273_v18, 7 }
 0x139   :  { %852 = vmatpush1.msra.mxu1 %v2731_v41  ;;  %885 = vmatprep.mubr.f32.mxu1 %v3632_v49  ;;  %v271_v41 = vld [vmem:[%s3512_s7] sm:$0xf]  ;;  %s2336_s7 = smov [#allocation6]  }
 0x13a   :  { %923 = vmatpush1.msra.mxu0 %v2739_v44  ;;  %956 = vmatprep.mubr.f32.mxu0 %v3632_v49  ;;  %v275_v14 = vsub.s32 0, %v274_v13  ;;  %v283_v54 = vsub.s32 2, %v274_v13  ;;  %v279_v57 = vsub.s32 1, %v274_v13  ;;  %s2055_s28 = sshll.u32 %s2336_s7, 4  ;;  %s2056_s28 = int_to_ptr.vmem [resolvable:$true] %s2055_s28 }
 0x13b   :  { %997 = vmatprep.subr.mxu1 %v2509_v45  ;;  %1068 = vmatprep.subr.mxu0 %v2511_v46  ;;  %v287_v45 = vsub.s32 3, %v274_v13  ;;  %s2307_s29 = scalar_lea.vmem %s2056_s28, 128  ;;  %p2312_p6 = scmp.lt.s32.totalorder %s2056_s28, %s2056_s28 }
 0x13c   :  { %v276_v59 = vrot.slane %v271_v41, %v275_v14  ;;  %v2828_v46 = vrot.slane %v271_v41, %v283_v54  ;;  %v280_v43 = vrot.slane %v271_v41, %v279_v57  ;;  %p2308_p5 = scmp.ne.s32.totalorder %s2056_s28, %s2307_s29  ;;  %p2313_p7 = scmp.lt.s32.totalorder %s2307_s29, %s2307_s29 }
 0x13d   :  { %v2832_v27 = vrot.slane %v271_v41, %v287_v45 }
 0x13e   :  { %p2314_p8 = por %p2313_p7, %p2312_p6 }
 0x140   :  { %p2315_p9 = pnand %p2314_p8, %p2308_p5 }
 0x1aa   :  { %v2817_v39 = vpop.f32.mrf.mxu1  ;;  %v2819_v22 = vpop.f32.mrf.mxu0 }
 0x1ac   :  { %v2824_v44 = vpop.f32.mrf.mxu1  ;;  %v2826_v49 = vpop.f32.mrf.mxu0 }
 0x1af   :  { %v390_v18 = vpop.f32.mrf.mxu1 }
 0x1b0   :  { %v2830_v31 = vadd.f32 %v390_v18, %v276_v59  ;;  %v503_v33 = vpop.f32.mrf.mxu0 }
 0x1b1   :  { %v2835_v29 = vadd.f32 %v503_v33, %v2828_v46  ;;  %v392_v16 = vpop.f32.mrf.mxu1 }
 0x1b2   :  { %3635 = vst [vmem:[#allocation31_spill] sm:$0xff] %v2830_v31  ;;  %v2837_v20 = vadd.f32 %v392_v16, %v280_v43  ;;  %v505_v7 = vpop.f32.mrf.mxu0 }
 0x1b3   :  { %3636 = vst [vmem:[#allocation32_spill] sm:$0xff] %v2835_v29  ;;  %v2840_v3 = vadd.f32 %v505_v7, %v2832_v27 }
 0x1b4   :  { %3637 = vst [vmem:[#allocation33_spill] sm:$0xff] %v2837_v20 }
 0x1b5   :  { %3638 = vst [vmem:[#allocation34_spill] sm:$0xff] %v2840_v3  ;;  %v396_v14 = vpop.f32.mrf.mxu1 }
 0x1b6   :  { %v2842_v13 = vadd.f32 %v396_v14, %v276_v59  ;;  %v509_v54 = vpop.f32.mrf.mxu0 }
 0x1b7   :  { %v2845_v57 = vadd.f32 %v509_v54, %v2828_v46  ;;  %v398_v18 = vpop.f32.mrf.mxu1 }
 0x1b8   :  { %3639 = vst [vmem:[#allocation35_spill] sm:$0xff] %v2842_v13  ;;  %v2847_v45 = vadd.f32 %v398_v18, %v280_v43  ;;  %v511_v41 = vpop.f32.mrf.mxu0 }
 0x1b9   :  { %3640 = vst [vmem:[#allocation36_spill] sm:$0xff] %v2845_v57  ;;  %v2850_v33 = vadd.f32 %v511_v41, %v2832_v27 }
 0x1ba   :  { %3641 = vst [vmem:[#allocation37_spill] sm:$0xff] %v2847_v45 }
 0x1bb   :  { %3642 = vst [vmem:[#allocation38_spill] sm:$0xff] %v2850_v33  ;;  %v402_v16 = vpop.f32.mrf.mxu1 }
 0x1bc   :  { %v2852_v29 = vadd.f32 %v402_v16, %v276_v59  ;;  %v515_v20 = vpop.f32.mrf.mxu0 }
 0x1bd   :  { %v2855_v7 = vadd.f32 %v515_v20, %v2828_v46  ;;  %v404_v14 = vpop.f32.mrf.mxu1 }
 0x1be   :  { %3643 = vst [vmem:[#allocation39_spill] sm:$0xff] %v2852_v29  ;;  %v2857_v13 = vadd.f32 %v404_v14, %v280_v43  ;;  %v517_v3 = vpop.f32.mrf.mxu0 }
 0x1bf   :  { %3644 = vst [vmem:[#allocation40_spill] sm:$0xff] %v2855_v7  ;;  %v2860_v54 = vadd.f32 %v517_v3, %v2832_v27 }
 0x1c0   :  { %3645 = vst [vmem:[#allocation41_spill] sm:$0xff] %v2857_v13 }
 0x1c1   :  { %3646 = vst [vmem:[#allocation42_spill] sm:$0xff] %v2860_v54  ;;  %v408_v18 = vpop.f32.mrf.mxu1 }
 0x1c2   :  { %v2862_v57 = vadd.f32 %v408_v18, %v276_v59  ;;  %v521_v45 = vpop.f32.mrf.mxu0 }
 0x1c3   :  { %v2865_v41 = vadd.f32 %v521_v45, %v2828_v46  ;;  %v410_v16 = vpop.f32.mrf.mxu1 }
 0x1c4   :  { %3647 = vst [vmem:[#allocation43_spill] sm:$0xff] %v2862_v57  ;;  %v2867_v29 = vadd.f32 %v410_v16, %v280_v43  ;;  %v523_v33 = vpop.f32.mrf.mxu0 }
 0x1c5   :  { %3648 = vst [vmem:[#allocation44_spill] sm:$0xff] %v2865_v41  ;;  %v2870_v20 = vadd.f32 %v523_v33, %v2832_v27 }
 0x1c6   :  { %3649 = vst [vmem:[#allocation45_spill] sm:$0xff] %v2867_v29 }
 0x1c7   :  { %3650 = vst [vmem:[#allocation46_spill] sm:$0xff] %v2870_v20  ;;  %v414_v14 = vpop.f32.mrf.mxu1 }
 0x1c8   :  { %v2872_v7 = vadd.f32 %v414_v14, %v276_v59  ;;  %v527_v13 = vpop.f32.mrf.mxu0 }
 0x1c9   :  { %v2875_v3 = vadd.f32 %v527_v13, %v2828_v46  ;;  %v416_v18 = vpop.f32.mrf.mxu1 }
 0x1ca   :  { %3651 = vst [vmem:[#allocation47_spill] sm:$0xff] %v2872_v7  ;;  %v2877_v57 = vadd.f32 %v416_v18, %v280_v43  ;;  %v529_v54 = vpop.f32.mrf.mxu0 }
 0x1cb   :  { %3652 = vst [vmem:[#allocation48_spill] sm:$0xff] %v2875_v3  ;;  %v2880_v45 = vadd.f32 %v529_v54, %v2832_v27 }
 0x1cc   :  { %3653 = vst [vmem:[#allocation49_spill] sm:$0xff] %v2877_v57 }
 0x1cd   :  { %3654 = vst [vmem:[#allocation50_spill] sm:$0xff] %v2880_v45  ;;  %v420_v16 = vpop.f32.mrf.mxu1 }
 0x1ce   :  { %v2882_v41 = vadd.f32 %v420_v16, %v276_v59  ;;  %v533_v29 = vpop.f32.mrf.mxu0 }
 0x1cf   :  { %v2885_v33 = vadd.f32 %v533_v29, %v2828_v46  ;;  %v422_v14 = vpop.f32.mrf.mxu1 }
 0x1d0   :  { %3655 = vst [vmem:[#allocation51_spill] sm:$0xff] %v2882_v41  ;;  %v2887_v7 = vadd.f32 %v422_v14, %v280_v43  ;;  %v535_v20 = vpop.f32.mrf.mxu0  ;;  %v385_v14 = vadd.f32 %v2817_v39, %v276_v59 }
 0x1d1   :  { %3656 = vst [vmem:[#allocation52_spill] sm:$0xff] %v2885_v33  ;;  %v2890_v13 = vadd.f32 %v535_v20, %v2832_v27  ;;  %v387_v20 = vadd.f32 %v2824_v44, %v280_v43 }
 0x1d2   :  { %3657 = vst [vmem:[#allocation53_spill] sm:$0xff] %v2887_v7 }
 0x1d3   :  { %3658 = vst [vmem:[#allocation54_spill] sm:$0xff] %v2890_v13  ;;  %v426_v18 = vpop.f32.mrf.mxu1 }
 0x1d4   :  { %v2892_v3 = vadd.f32 %v426_v18, %v276_v59  ;;  %v539_v57 = vpop.f32.mrf.mxu0 }
 0x1d5   :  { %v2895_v54 = vadd.f32 %v539_v57, %v2828_v46  ;;  %v428_v16 = vpop.f32.mrf.mxu1  ;;  %v498_v57 = vadd.f32 %v2819_v22, %v2828_v46 }
 0x1d6   :  { %3659 = vst [vmem:[#allocation55_spill] sm:$0xff] %v2892_v3  ;;  %v2897_v41 = vadd.f32 %v428_v16, %v280_v43  ;;  %v541_v45 = vpop.f32.mrf.mxu0 }
 0x1d7   :  { %3660 = vst [vmem:[#allocation56_spill] sm:$0xff] %v2895_v54  ;;  %v2900_v29 = vadd.f32 %v541_v45, %v2832_v27  ;;  %v500_v45 = vadd.f32 %v2826_v49, %v2832_v27 }
 0x1d8   :  { %3661 = vst [vmem:[#allocation57_spill] sm:$0xff] %v2897_v41 }
 0x1d9   :  { %3662 = vst [vmem:[#allocation58_spill] sm:$0xff] %v2900_v29  ;;  %v711_v33 = vpop.f32.mrf.mxu1  ;;  %v782_v31 = vpop.f32.mrf.mxu0  ;;  %v3682_v29 = vmov 0.0  }
 0x1da   :  { %v787_v13 = vadd.f32 %v711_v33, %v385_v14  ;;  %v789_v54 = vadd.f32 %v782_v31, %v498_v57  ;;  %v3664_v57 = vld [vmem:[#allocation13_spill] sm:$0xff] }
 0x1db   :  { %v713_v7 = vpop.f32.mrf.mxu1  ;;  %v784_v41 = vpop.f32.mrf.mxu0 }
 0x1dc   :  { %v791_v18 = vmul.f32 0.5, %v787_v13  ;;  %v788_v3 = vadd.f32 %v713_v7, %v387_v20  ;;  %v790_v39 = vadd.f32 %v784_v41, %v500_v45  ;;  %v3666_v45 = vld [vmem:[#allocation15_spill] sm:$0xff] }
 0x1de   :  { %2143 = vtanh.f32 %v791_v18  ;;  %v795_v16 = vmul.f32 0.5, %v788_v3  ;;  %v800_v59 = vmul.f32 0.5, %v790_v39  ;;  %v3667_v39 = vld [vmem:[#allocation14_spill] sm:$0xff] }
 0x1e0   :  { %2145 = vtanh.f32 %v795_v16  ;;  %v3665_v16 = vld [vmem:[#allocation12_spill] sm:$0xff] }
 0x1e1   :  { %2147 = vtanh.f32 %v789_v54  ;;  %v3663_v54 = vld [vmem:[#allocation11_spill] sm:$0xff] }
 0x1e2   :  { %2149 = vtanh.f32 %v800_v59  ;;  %v3668_v59 = vld [vmem:[#allocation17_spill] sm:$0xff] }
 0x1eb   :  { %v2144_v44 = vpop.eup %2143 }
 0x1ec   :  { %v793_v43 = vadd.f32 1.0, %v2144_v44  ;;  %v3669_v44 = vld [vmem:[#allocation16_spill] sm:$0xff] }
 0x1ed   :  { %v2146_v33 = vpop.eup %2145 }
 0x1ee   :  { %v794_v13 = vmul.f32 0.5, %v793_v43  ;;  %v797_v7 = vadd.f32 1.0, %v2146_v33  ;;  %v2148_v20 = vpop.eup %2147  ;;  %v3670_v43 = vld [vmem:[#allocation19_spill] sm:$0xff]  ;;  %v3671_v33 = vld [vmem:[#allocation18_spill] sm:$0xff] }
 0x1ef   :  { %v2150_v31 = vpop.eup %2149 }
 0x1f0   :  { %v798_v14 = vmul.f32 0.5, %v797_v7  ;;  %v805_v22 = vmul.f32 %v2148_v20, %v794_v13  ;;  %v802_v18 = vadd.f32 1.0, %v2150_v31  ;;  %v3672_v13 = vld [vmem:[#allocation21_spill] sm:$0xff]  ;;  %v3673_v7 = vld [vmem:[#allocation20_spill] sm:$0xff]  ;;  %v3675_v20 = vld [vmem:[#allocation22_spill] sm:$0xff] }
 0x1f1   :  { %v3678_v31 = vld [vmem:[#allocation27_spill] sm:$0xff] }
 0x1f2   :  { %v804_v46 = vmul.f32 0.0, %v798_v14  ;;  %v803_v27 = vmul.f32 0.5, %v802_v18  ;;  %v3674_v14 = vld [vmem:[#allocation23_spill] sm:$0xff]  ;;  %v3679_v18 = vld [vmem:[#allocation26_spill] sm:$0xff] }
 0x1f4   :  { %v2908_v3 = vadd.f32 %v805_v22, %v804_v46  ;;  %v3676_v46 = vld [vmem:[#allocation25_spill] sm:$0xff]  ;;  %v3677_v22 = vld [vmem:[#allocation24_spill] sm:$0xff] }
 0x1f6   :  { %2151 = vtanh.f32 %v2908_v3 }
 0x203   :  { %v2152_v49 = vpop.eup %2151 }
 0x204   :  { %v2911_v41 = vmul.f32 %v2152_v49, %v803_v27  ;;  %v3680_v27 = vld [vmem:[#allocation29_spill] sm:$0xff]  ;;  %v3681_v49 = vld [vmem:[#allocation28_spill] sm:$0xff] }
 0x206   :  { %886 = vmatmul.mubr.f32.vlgmr.msra.gmra.mxu1 %v2911_v41  ;;  %957 = vmatmul.mubr.f32.vlgmr.msra.gmra.mxu0 %v2911_v41 }
 0x207   :  { %998 = vmatpush1.msra.mxu1 %v2525_v61  ;;  %1069 = vmatpush1.msra.mxu0 %v2527_v62 }
 0x208   :  { %999 = vmatprep.subr.mxu1 %v2529_v63  ;;  %1070 = vmatprep.subr.mxu0 %v2531_v0 }
 0x209   :  { %1000 = vmatpush1.msra.mxu1 %v2535_v2  ;;  %1071 = vmatpush1.msra.mxu0 %v2544_v6 }
 0x20a   :  { %1001 = vmatprep.subr.mxu1 %v2540_v4  ;;  %1072 = vmatprep.subr.mxu0 %v2552_v9 }
 0x20b   :  { %1002 = vmatpush1.msra.mxu1 %v2548_v8  ;;  %1073 = vmatpush1.msra.mxu0 %v2558_v11 }
 0x20c   :  { %1003 = vmatprep.subr.mxu1 %v2554_v10  ;;  %1074 = vmatprep.subr.mxu0 %v2564_v15 }
 0x20d   :  { %1004 = vmatpush1.msra.mxu1 %v2560_v12  ;;  %1075 = vmatpush1.msra.mxu0 %v2573_v19 }
 0x20e   :  { %1005 = vmatprep.subr.mxu1 %v2569_v17  ;;  %1076 = vmatprep.subr.mxu0 %v2581_v23 }
 0x20f   :  { %1006 = vmatpush1.msra.mxu1 %v2577_v21  ;;  %1077 = vmatpush1.msra.mxu0 %v2587_v25 }
 0x210   :  { %1007 = vmatprep.subr.mxu1 %v2583_v24  ;;  %1078 = vmatprep.subr.mxu0 %v2593_v28 }
 0x211   :  { %1008 = vmatpush1.msra.mxu1 %v2589_v26  ;;  %1079 = vmatpush1.msra.mxu0 %v2602_v32 }
 0x212   :  { %1009 = vmatprep.subr.mxu1 %v2598_v30  ;;  %1080 = vmatprep.subr.mxu0 %v2610_v35 }
 0x213   :  { %1010 = vmatpush1.msra.mxu1 %v2606_v34  ;;  %1081 = vmatpush1.msra.mxu0 %v2616_v37 }
 0x214   :  { %1011 = vmatprep.subr.mxu1 %v2612_v36  ;;  %1082 = vmatprep.subr.mxu0 %v2622_v40 }
 0x215   :  { %1012 = vmatpush1.msra.mxu1 %v2618_v38  ;;  %1083 = vmatpush1.msra.mxu0 %v2631_v47 }
 0x216   :  { %1013 = vmatprep.subr.mxu1 %v2627_v42  ;;  %1084 = vmatprep.subr.mxu0 %v2639_v48 }
 0x217   :  { %1014 = vmatpush1.msra.mxu1 %v2635_v50  ;;  %1085 = vmatpush1.msra.mxu0 %v2645_v52 }
 0x218   :  { %1015 = vmatprep.subr.mxu1 %v2641_v51  ;;  %1086 = vmatprep.subr.mxu0 %v2651_v55 }
 0x219   :  { %1016 = vmatpush1.msra.mxu1 %v2647_v53  ;;  %1087 = vmatpush1.msra.mxu0 %v2659_v58 }
 0x21a   :  { %1017 = vmatprep.subr.mxu1 %v2655_v56  ;;  %1088 = vmatprep.subr.mxu0 %v2667_v1 }
 0x21b   :  { %1018 = vmatpush1.msra.mxu1 %v2663_v60  ;;  %1089 = vmatpush1.msra.mxu0 %v2673_v5 }
 0x21c   :  { %1019 = vmatprep.subr.mxu1 %v3663_v54  ;;  %1090 = vmatprep.subr.mxu0 %v3664_v57 }
 0x21d   :  { %1020 = vmatpush1.msra.mxu1 %v3665_v16  ;;  %1091 = vmatpush1.msra.mxu0 %v3666_v45 }
 0x21e   :  { %1021 = vmatprep.subr.mxu1 %v3667_v39  ;;  %1092 = vmatprep.subr.mxu0 %v3668_v59 }
 0x21f   :  { %1022 = vmatpush1.msra.mxu1 %v3669_v44  ;;  %1093 = vmatpush1.msra.mxu0 %v3670_v43  ;;  %v3687_v43 = vld [vmem:[#allocation33_spill] sm:$0xff] }
 0x220   :  { %1023 = vmatprep.subr.mxu1 %v3671_v33  ;;  %1094 = vmatprep.subr.mxu0 %v3672_v13  ;;  %v3683_v13 = vld [vmem:[#allocation30_spill] sm:$0xff] }
 0x221   :  { %1024 = vmatpush1.msra.mxu1 %v3673_v7  ;;  %1095 = vmatpush1.msra.mxu0 %v3674_v14  ;;  %v3684_v14 = vld [vmem:[#allocation9_spill] sm:$0xff] }
 0x222   :  { %1025 = vmatprep.subr.mxu1 %v3675_v20  ;;  %1096 = vmatprep.subr.mxu0 %v3676_v46  ;;  %v3685_v20 = vld [vmem:[#allocation10_spill] sm:$0xff] }
 0x223   :  { %1026 = vmatpush1.msra.mxu1 %v3677_v22  ;;  %1097 = vmatpush1.msra.mxu0 %v3678_v31  ;;  %v3686_v22 = vld [vmem:[#allocation31_spill] sm:$0xff] }
 0x224   :  { %1027 = vmatprep.subr.mxu1 %v3679_v18  ;;  %1098 = vmatprep.subr.mxu0 %v3680_v27 }
 0x225   :  { %1028 = vmatpush1.msra.mxu1 %v3681_v49  ;;  %1061 = vmatprep.mubr.f32.mxu1 %v3682_v29  ;;  %v3688_v49 = vld [vmem:[#allocation32_spill] sm:$0xff] }
 0x226   :  { %1099 = vmatpush1.msra.mxu0 %v3683_v13  ;;  %1132 = vmatprep.mubr.f32.mxu0 %v3682_v29  ;;  %v3689_v29 = vld [vmem:[#allocation34_spill] sm:$0xff] }
 0x227   :  { %1173 = vmatprep.subr.mxu1 %v3684_v14  ;;  %1244 = vmatprep.subr.mxu0 %v3685_v20 }
 0x2c6   :  { %v887_v46 = vpop.f32.mrf.mxu1  ;;  %v958_v31 = vpop.f32.mrf.mxu0 }
 0x2c7   :  { %v963_v7 = vadd.f32 %v887_v46, %v3686_v22  ;;  %v965_v44 = vadd.f32 %v958_v31, %v3688_v49  ;;  %v3716_v49 = vld [vmem:[#allocation38_spill] sm:$0xff] }
 0x2c8   :  { %v889_v33 = vpop.f32.mrf.mxu1  ;;  %v960_v13 = vpop.f32.mrf.mxu0 }
 0x2c9   :  { %v967_v18 = vmul.f32 0.5, %v963_v7  ;;  %v964_v27 = vadd.f32 %v889_v33, %v3687_v43  ;;  %v966_v39 = vadd.f32 %v960_v13, %v3689_v29 }
 0x2cb   :  { %2153 = vtanh.f32 %v967_v18  ;;  %v971_v59 = vmul.f32 0.5, %v964_v27  ;;  %v976_v14 = vmul.f32 0.5, %v966_v39  ;;  %v813_v39 = vpop.permute.xlu0 %812 }
 0x2cc   :  { %vm814_vm10 = vcmp.eq.s32.totalorder %v813_v39, 1 }
 0x2cd   :  { %2155 = vtanh.f32 %v971_v59 }
 0x2ce   :  { %2157 = vtanh.f32 %v965_v44 }
 0x2cf   :  { %2159 = vtanh.f32 %v976_v14 }
 0x2d8   :  { %v2154_v45 = vpop.eup %2153 }
 0x2d9   :  { %v969_v20 = vadd.f32 1.0, %v2154_v45  ;;  %v989_v45 = vpop.permute.xlu1 %988 }
 0x2da   :  { %v2156_v16 = vpop.eup %2155  ;;  %vm990_vm11 = vcmp.eq.s32.totalorder %v989_v45, 1 }
 0x2db   :  { %v970_v57 = vmul.f32 0.5, %v969_v20  ;;  %v973_v46 = vadd.f32 1.0, %v2156_v16  ;;  %v2158_v22 = vpop.eup %2157  ;;  %v815_v16 = vsel %vm814_vm10, %v2911_v41, 0.0  ;;  %v3715_v41 = vld [vmem:[#allocation36_spill] sm:$0xff] }
 0x2dc   :  { %v2160_v59 = vpop.eup %2159 }
 0x2dd   :  { %v974_v7 = vmul.f32 0.5, %v973_v46  ;;  %v981_v54 = vmul.f32 %v2158_v22, %v970_v57  ;;  %v978_v44 = vadd.f32 1.0, %v2160_v59 }
 0x2df   :  { %v980_v43 = vmul.f32 %v974_v7, %v2908_v3  ;;  %v979_v31 = vmul.f32 0.5, %v978_v44 }
 0x2e1   :  { %v2986_v33 = vadd.f32 %v981_v54, %v980_v43 }
 0x2e3   :  { %2161 = vtanh.f32 %v2986_v33 }
 0x2f0   :  { %v2162_v29 = vpop.eup %2161 }
 0x2f1   :  { %v984_v13 = vmul.f32 %v2162_v29, %v979_v31 }
 0x2f3   :  { %v2990_v18 = vsel %vm990_vm11, %v984_v13, %v815_v16  ;;  %1062 = vmatmul.mubr.f32.vlgmr.msra.gmra.mxu1 %v984_v13  ;;  %1133 = vmatmul.mubr.f32.vlgmr.msra.gmra.mxu0 %v984_v13 }
 0x2f4   :  { %1174 = vmatpush1.msra.mxu1 %v2525_v61  ;;  %1245 = vmatpush1.msra.mxu0 %v2527_v62  ;;  %v3690_v61 = vld [vmem:[#allocation11_spill] sm:$0xff]  ;;  %v3691_v62 = vld [vmem:[#allocation13_spill] sm:$0xff] }
 0x2f5   :  { %1175 = vmatprep.subr.mxu1 %v2529_v63  ;;  %1246 = vmatprep.subr.mxu0 %v2531_v0  ;;  %v3692_v63 = vld [vmem:[#allocation12_spill] sm:$0xff]  ;;  %v3693_v0 = vld [vmem:[#allocation15_spill] sm:$0xff] }
 0x2f6   :  { %1176 = vmatpush1.msra.mxu1 %v2535_v2  ;;  %1247 = vmatpush1.msra.mxu0 %v2544_v6  ;;  %v3694_v2 = vld [vmem:[#allocation14_spill] sm:$0xff]  ;;  %v3696_v6 = vld [vmem:[#allocation16_spill] sm:$0xff] }
 0x2f7   :  { %1177 = vmatprep.subr.mxu1 %v2540_v4  ;;  %1248 = vmatprep.subr.mxu0 %v2552_v9  ;;  %v3695_v4 = vld [vmem:[#allocation17_spill] sm:$0xff]  ;;  %v3698_v9 = vld [vmem:[#allocation18_spill] sm:$0xff] }
 0x2f8   :  { %1178 = vmatpush1.msra.mxu1 %v2548_v8  ;;  %1249 = vmatpush1.msra.mxu0 %v2558_v11  ;;  %v3697_v8 = vld [vmem:[#allocation19_spill] sm:$0xff]  ;;  %v3700_v11 = vld [vmem:[#allocation20_spill] sm:$0xff] }
 0x2f9   :  { %1179 = vmatprep.subr.mxu1 %v2554_v10  ;;  %1250 = vmatprep.subr.mxu0 %v2564_v15  ;;  %v3699_v10 = vld [vmem:[#allocation21_spill] sm:$0xff]  ;;  %v3702_v15 = vld [vmem:[#allocation22_spill] sm:$0xff] }
 0x2fa   :  { %1180 = vmatpush1.msra.mxu1 %v2560_v12  ;;  %1251 = vmatpush1.msra.mxu0 %v2573_v19  ;;  %v3701_v12 = vld [vmem:[#allocation23_spill] sm:$0xff]  ;;  %v3704_v19 = vld [vmem:[#allocation24_spill] sm:$0xff] }
 0x2fb   :  { %1181 = vmatprep.subr.mxu1 %v2569_v17  ;;  %1252 = vmatprep.subr.mxu0 %v2581_v23  ;;  %v3703_v17 = vld [vmem:[#allocation25_spill] sm:$0xff]  ;;  %v3706_v23 = vld [vmem:[#allocation26_spill] sm:$0xff] }
 0x2fc   :  { %1182 = vmatpush1.msra.mxu1 %v2577_v21  ;;  %1253 = vmatpush1.msra.mxu0 %v2587_v25  ;;  %v3705_v21 = vld [vmem:[#allocation27_spill] sm:$0xff]  ;;  %v3708_v25 = vld [vmem:[#allocation28_spill] sm:$0xff] }
 0x2fd   :  { %1183 = vmatprep.subr.mxu1 %v2583_v24  ;;  %1254 = vmatprep.subr.mxu0 %v2593_v28  ;;  %v3707_v24 = vld [vmem:[#allocation29_spill] sm:$0xff]  ;;  %v3710_v28 = vld [vmem:[#allocation30_spill] sm:$0xff] }
 0x2fe   :  { %1184 = vmatpush1.msra.mxu1 %v2589_v26  ;;  %1255 = vmatpush1.msra.mxu0 %v2602_v32  ;;  %v3709_v26 = vmov 0.0   ;;  %v3059_v32 = vld [vmem:[#allocation3 + $0x1f8] sm:$0xff] }
 0x2ff   :  { %1185 = vmatprep.subr.mxu1 %v2598_v30  ;;  %1256 = vmatprep.subr.mxu0 %v2610_v35  ;;  %v3056_v30 = vld [vmem:[#allocation3 + $0x1e8] sm:$0xff]  ;;  %3712 = vst [vmem:[#allocation10_spill] sm:$0xff] %v3059_v32  ;;  %v3713_v35 = vld [vmem:[#allocation35_spill] sm:$0xff] }
 0x300   :  { %1186 = vmatpush1.msra.mxu1 %v2606_v34  ;;  %1257 = vmatpush1.msra.mxu0 %v2616_v37  ;;  %3711 = vst [vmem:[#allocation9_spill] sm:$0xff] %v3056_v30 }
 0x301   :  { %1187 = vmatprep.subr.mxu1 %v2612_v36  ;;  %1258 = vmatprep.subr.mxu0 %v2622_v40 }
 0x302   :  { %1188 = vmatpush1.msra.mxu1 %v2618_v38  ;;  %1259 = vmatpush1.msra.mxu0 %v2631_v47 }
 0x303   :  { %1189 = vmatprep.subr.mxu1 %v2627_v42  ;;  %1260 = vmatprep.subr.mxu0 %v2639_v48  ;;  %v3714_v42 = vld [vmem:[#allocation37_spill] sm:$0xff] }
 0x304   :  { %1190 = vmatpush1.msra.mxu1 %v2635_v50  ;;  %1261 = vmatpush1.msra.mxu0 %v2645_v52 }
 0x305   :  { %1191 = vmatprep.subr.mxu1 %v2641_v51  ;;  %1262 = vmatprep.subr.mxu0 %v2651_v55 }
 0x306   :  { %1192 = vmatpush1.msra.mxu1 %v2647_v53  ;;  %1263 = vmatpush1.msra.mxu0 %v2659_v58 }
 0x307   :  { %1193 = vmatprep.subr.mxu1 %v2655_v56  ;;  %1264 = vmatprep.subr.mxu0 %v2667_v1 }
 0x308   :  { %1194 = vmatpush1.msra.mxu1 %v2663_v60  ;;  %1265 = vmatpush1.msra.mxu0 %v2673_v5 }
 0x309   :  { %1195 = vmatprep.subr.mxu1 %v3690_v61  ;;  %1266 = vmatprep.subr.mxu0 %v3691_v62 }
 0x30a   :  { %1196 = vmatpush1.msra.mxu1 %v3692_v63  ;;  %1267 = vmatpush1.msra.mxu0 %v3693_v0 }
 0x30b   :  { %1197 = vmatprep.subr.mxu1 %v3694_v2  ;;  %1268 = vmatprep.subr.mxu0 %v3695_v4 }
 0x30c   :  { %1198 = vmatpush1.msra.mxu1 %v3696_v6  ;;  %1269 = vmatpush1.msra.mxu0 %v3697_v8 }
 0x30d   :  { %1199 = vmatprep.subr.mxu1 %v3698_v9  ;;  %1270 = vmatprep.subr.mxu0 %v3699_v10 }
 0x30e   :  { %1200 = vmatpush1.msra.mxu1 %v3700_v11  ;;  %1271 = vmatpush1.msra.mxu0 %v3701_v12 }
 0x30f   :  { %1201 = vmatprep.subr.mxu1 %v3702_v15  ;;  %1272 = vmatprep.subr.mxu0 %v3703_v17 }
 0x310   :  { %1202 = vmatpush1.msra.mxu1 %v3704_v19  ;;  %1273 = vmatpush1.msra.mxu0 %v3705_v21 }
 0x311   :  { %1203 = vmatprep.subr.mxu1 %v3706_v23  ;;  %1274 = vmatprep.subr.mxu0 %v3707_v24 }
 0x312   :  { %1204 = vmatpush1.msra.mxu1 %v3708_v25  ;;  %1237 = vmatprep.mubr.f32.mxu1 %v3709_v26 }
 0x313   :  { %1275 = vmatpush1.msra.mxu0 %v3710_v28  ;;  %1308 = vmatprep.mubr.f32.mxu0 %v3709_v26 }
 0x314   :  { %1349 = vmatprep.subr.mxu1 %v3056_v30  ;;  %1420 = vmatprep.subr.mxu0 %v3059_v32 }
 0x3b3   :  { %v1063_v34 = vpop.f32.mrf.mxu1  ;;  %v1134_v37 = vpop.f32.mrf.mxu0 }
 0x3b4   :  { %v1139_v36 = vadd.f32 %v1063_v34, %v3713_v35  ;;  %v1141_v54 = vadd.f32 %v1134_v37, %v3715_v41  ;;  %v3088_v41 = vld [vmem:[#allocation3 + $0x1d0] sm:$0xff] }
 0x3b5   :  { %v1065_v38 = vpop.f32.mrf.mxu1  ;;  %v1136_v27 = vpop.f32.mrf.mxu0 }
 0x3b6   :  { %v1143_v40 = vmul.f32 0.5, %v1139_v36  ;;  %v1140_v3 = vadd.f32 %v1065_v38, %v3714_v42  ;;  %v1142_v14 = vadd.f32 %v1136_v27, %v3716_v49  ;;  %v1165_v36 = vpop.permute.xlu0 %1164  ;;  %v3079_v42 = vld [vmem:[#allocation3 + $0x1c8] sm:$0xff]  ;;  %v3097_v27 = vld [vmem:[#allocation3 + $0x1a0] sm:$0xff]  ;;  %v3100_v49 = vld [vmem:[#allocation3 + $0x1b0] sm:$0xff] }
 0x3b7   :  { %vm1166_vm12 = vcmp.eq.s32.totalorder %v1165_v36, 1  ;;  %v3148_v36 = vld [vmem:[#allocation3 + $0x130] sm:$0xff] }
 0x3b8   :  { %2163 = vtanh.f32 %v1143_v40  ;;  %v1147_v57 = vmul.f32 0.5, %v1140_v3  ;;  %v1152_v20 = vmul.f32 0.5, %v1142_v14  ;;  %v3073_v40 = vld [vmem:[#allocation3 + $0x1e0] sm:$0xff]  ;;  %v3082_v3 = vld [vmem:[#allocation3 + $0x1d8] sm:$0xff]  ;;  %v3103_v14 = vld [vmem:[#allocation3 + $0x188] sm:$0xff] }
 0x3ba   :  { %2165 = vtanh.f32 %v1147_v57  ;;  %v3094_v57 = vld [vmem:[#allocation3 + $0x1b8] sm:$0xff] }
 0x3bb   :  { %2167 = vtanh.f32 %v1141_v54  ;;  %v3091_v54 = vld [vmem:[#allocation3 + $0x1a8] sm:$0xff] }
 0x3bc   :  { %2169 = vtanh.f32 %v1152_v20  ;;  %v3106_v20 = vld [vmem:[#allocation3 + $0x198] sm:$0xff] }
 0x3c5   :  { %v2164_v46 = vpop.eup %2163 }
 0x3c6   :  { %v1145_v22 = vadd.f32 1.0, %v2164_v46  ;;  %v3109_v46 = vld [vmem:[#allocation3 + $0x180] sm:$0xff] }
 0x3c7   :  { %v2166_v7 = vpop.eup %2165 }
 0x3c8   :  { %v1146_v43 = vmul.f32 0.5, %v1145_v22  ;;  %v1149_v59 = vadd.f32 1.0, %v2166_v7  ;;  %v2168_v44 = vpop.eup %2167  ;;  %v3112_v22 = vld [vmem:[#allocation3 + $0x190] sm:$0xff]  ;;  %v3115_v7 = vld [vmem:[#allocation3 + $0x168] sm:$0xff] }
 0x3c9   :  { %v2170_v13 = vpop.eup %2169 }
 0x3ca   :  { %v1150_v31 = vmul.f32 0.5, %v1149_v59  ;;  %v1157_v29 = vmul.f32 %v2168_v44, %v1146_v43  ;;  %v1154_v16 = vadd.f32 1.0, %v2170_v13  ;;  %v3118_v43 = vld [vmem:[#allocation3 + $0x178] sm:$0xff]  ;;  %v3121_v59 = vld [vmem:[#allocation3 + $0x160] sm:$0xff]  ;;  %v3124_v44 = vld [vmem:[#allocation3 + $0x170] sm:$0xff] }
 0x3cb   :  { %v3136_v13 = vld [vmem:[#allocation3 + $0x150] sm:$0xff] }
 0x3cc   :  { %v1156_v39 = vmul.f32 %v1150_v31, %v2986_v33  ;;  %v1155_v34 = vmul.f32 0.5, %v1154_v16  ;;  %v3076_v33 = vld [vmem:[#allocation3 + $0x1f0] sm:$0xff]  ;;  %v3127_v31 = vld [vmem:[#allocation3 + $0x148] sm:$0xff]  ;;  %3717 = vst [vmem:[#allocation31_spill] sm:$0xff] %v3136_v13 }
 0x3cd   :  { %v3139_v16 = vld [vmem:[#allocation3 + $0x128] sm:$0xff] }
 0x3ce   :  { %v3067_v45 = vadd.f32 %v1157_v29, %v1156_v39  ;;  %v3130_v29 = vld [vmem:[#allocation3 + $0x158] sm:$0xff]  ;;  %v3133_v39 = vld [vmem:[#allocation3 + $0x140] sm:$0xff]  ;;  %3718 = vst [vmem:[#allocation33_spill] sm:$0xff] %v3139_v16 }
 0x3d0   :  { %2171 = vtanh.f32 %v3067_v45 }
 0x3dd   :  { %v2172_v35 = vpop.eup %2171 }
 0x3de   :  { %v1160_v37 = vmul.f32 %v2172_v35, %v1155_v34  ;;  %v3142_v34 = vld [vmem:[#allocation3 + $0x138] sm:$0xff]  ;;  %v3145_v35 = vld [vmem:[#allocation3 + $0x120] sm:$0xff] }
 0x3df   :  { %3719 = vst [vmem:[#allocation32_spill] sm:$0xff] %v3142_v34 }
 0x3e0   :  { %v3071_v38 = vsel %vm1166_vm12, %v1160_v37, %v2990_v18  ;;  %1238 = vmatmul.mubr.f32.vlgmr.msra.gmra.mxu1 %v1160_v37  ;;  %1309 = vmatmul.mubr.f32.vlgmr.msra.gmra.mxu0 %v1160_v37  ;;  %v3085_v18 = vld [vmem:[#allocation3 + $0x1c0] sm:$0xff]  ;;  %v3151_v37 = vld [vmem:[#allocation3 + $0x108] sm:$0xff] }
 0x3e1   :  { %1350 = vmatpush1.msra.mxu1 %v3073_v40  ;;  %1421 = vmatpush1.msra.mxu0 %v3076_v33 }
 0x3e2   :  { %1351 = vmatprep.subr.mxu1 %v3079_v42  ;;  %1422 = vmatprep.subr.mxu0 %v3082_v3 }
 0x3e3   :  { %1352 = vmatpush1.msra.mxu1 %v3085_v18  ;;  %1423 = vmatpush1.msra.mxu0 %v3088_v41 }
 0x3e4   :  { %1353 = vmatprep.subr.mxu1 %v3091_v54  ;;  %1424 = vmatprep.subr.mxu0 %v3094_v57 }
 0x3e5   :  { %1354 = vmatpush1.msra.mxu1 %v3097_v27  ;;  %1425 = vmatpush1.msra.mxu0 %v3100_v49 }
 0x3e6   :  { %1355 = vmatprep.subr.mxu1 %v3103_v14  ;;  %1426 = vmatprep.subr.mxu0 %v3106_v20 }
 0x3e7   :  { %1356 = vmatpush1.msra.mxu1 %v3109_v46  ;;  %1427 = vmatpush1.msra.mxu0 %v3112_v22 }
 0x3e8   :  { %1357 = vmatprep.subr.mxu1 %v3115_v7  ;;  %1428 = vmatprep.subr.mxu0 %v3118_v43 }
 0x3e9   :  { %1358 = vmatpush1.msra.mxu1 %v3121_v59  ;;  %1429 = vmatpush1.msra.mxu0 %v3124_v44 }
 0x3ea   :  { %1359 = vmatprep.subr.mxu1 %v3127_v31  ;;  %1430 = vmatprep.subr.mxu0 %v3130_v29 }
 0x3eb   :  { %1360 = vmatpush1.msra.mxu1 %v3133_v39  ;;  %1431 = vmatpush1.msra.mxu0 %v3136_v13  ;;  %v3154_v13 = vld [vmem:[#allocation3 + $0x118] sm:$0xff] }
 0x3ec   :  { %1361 = vmatprep.subr.mxu1 %v3139_v16  ;;  %1432 = vmatprep.subr.mxu0 %v3142_v34  ;;  %v3157_v16 = vld [vmem:[#allocation3 + $0x100] sm:$0xff]  ;;  %v3161_v34 = vld [vmem:[#allocation3 + $0xe8] sm:$0xff] }
 0x3ed   :  { %1362 = vmatpush1.msra.mxu1 %v3145_v35  ;;  %1433 = vmatpush1.msra.mxu0 %v3148_v36 }
 0x3ee   :  { %1363 = vmatprep.subr.mxu1 %v3151_v37  ;;  %1434 = vmatprep.subr.mxu0 %v3154_v13 }
 0x3ef   :  { %1364 = vmatpush1.msra.mxu1 %v3157_v16  ;;  %1435 = vmatpush1.msra.mxu0 %v2631_v47 }
 0x3f0   :  { %1365 = vmatprep.subr.mxu1 %v3161_v34  ;;  %1436 = vmatprep.subr.mxu0 %v2639_v48 }
 0x3f1   :  { %1366 = vmatpush1.msra.mxu1 %v2635_v50  ;;  %1437 = vmatpush1.msra.mxu0 %v2645_v52  ;;  %v3720_v50 = vld [vmem:[#allocation39_spill] sm:$0xff] }
 0x3f2   :  { %1367 = vmatprep.subr.mxu1 %v2641_v51  ;;  %1438 = vmatprep.subr.mxu0 %v2651_v55  ;;  %v3721_v55 = vld [vmem:[#allocation41_spill] sm:$0xff] }
 0x3f3   :  { %1368 = vmatpush1.msra.mxu1 %v2647_v53  ;;  %1439 = vmatpush1.msra.mxu0 %v2659_v58  ;;  %v3722_v58 = vld [vmem:[#allocation40_spill] sm:$0xff] }
 0x3f4   :  { %1369 = vmatprep.subr.mxu1 %v2655_v56  ;;  %1440 = vmatprep.subr.mxu0 %v2667_v1 }
 0x3f5   :  { %1370 = vmatpush1.msra.mxu1 %v2663_v60  ;;  %1441 = vmatpush1.msra.mxu0 %v2673_v5 }
 0x3f6   :  { %1371 = vmatprep.subr.mxu1 %v3690_v61  ;;  %1442 = vmatprep.subr.mxu0 %v3691_v62  ;;  %v3723_v61 = vld [vmem:[#allocation42_spill] sm:$0xff] }
 0x3f7   :  { %1372 = vmatpush1.msra.mxu1 %v3692_v63  ;;  %1443 = vmatpush1.msra.mxu0 %v3693_v0 }
 0x3f8   :  { %1373 = vmatprep.subr.mxu1 %v3694_v2  ;;  %1444 = vmatprep.subr.mxu0 %v3695_v4 }
 0x3f9   :  { %1374 = vmatpush1.msra.mxu1 %v3696_v6  ;;  %1445 = vmatpush1.msra.mxu0 %v3697_v8 }
 0x3fa   :  { %1375 = vmatprep.subr.mxu1 %v3698_v9  ;;  %1446 = vmatprep.subr.mxu0 %v3699_v10 }
 0x3fb   :  { %1376 = vmatpush1.msra.mxu1 %v3700_v11  ;;  %1447 = vmatpush1.msra.mxu0 %v3701_v12 }
 0x3fc   :  { %1377 = vmatprep.subr.mxu1 %v3702_v15  ;;  %1448 = vmatprep.subr.mxu0 %v3703_v17 }
 0x3fd   :  { %1378 = vmatpush1.msra.mxu1 %v3704_v19  ;;  %1449 = vmatpush1.msra.mxu0 %v3705_v21 }
 0x3fe   :  { %1379 = vmatprep.subr.mxu1 %v3706_v23  ;;  %1450 = vmatprep.subr.mxu0 %v3707_v24  ;;  %v1341_v24 = vpop.permute.xlu1 %1340 }
 0x3ff   :  { %1380 = vmatpush1.msra.mxu1 %v3708_v25  ;;  %1413 = vmatprep.mubr.f32.mxu1 %v3709_v26  ;;  %vm1342_vm13 = vcmp.eq.s32.totalorder %v1341_v24, 1  ;;  %v3321_v24 = vld [vmem:[#allocation3 + $0x30] sm:$0xff] }
 0x400   :  { %1451 = vmatpush1.msra.mxu0 %v3710_v28  ;;  %1484 = vmatprep.mubr.f32.mxu0 %v3709_v26  ;;  %3742 = vst [vmem:[#allocation24_spill] sm:$0xff] %v3321_v24 }
 0x401   :  { %1525 = vmatprep.subr.mxu1 %v3056_v30  ;;  %1596 = vmatprep.subr.mxu0 %v3059_v32 }
 0x4a0   :  { %v1239_v47 = vpop.f32.mrf.mxu1  ;;  %v1310_v51 = vpop.f32.mrf.mxu0 }
 0x4a1   :  { %v1315_v48 = vadd.f32 %v1239_v47, %v3720_v50  ;;  %v1317_v60 = vadd.f32 %v1310_v51, %v3722_v58  ;;  %v3726_v47 = vld [vmem:[#allocation32_spill] sm:$0xff]  ;;  %v3239_v50 = vld [vmem:[#allocation3 + $0x110] sm:$0xff] }
 0x4a2   :  { %v1241_v52 = vpop.f32.mrf.mxu1  ;;  %v1312_v5 = vpop.f32.mrf.mxu0  ;;  %v3246_v51 = vld [vmem:[#allocation3 + $0xe0] sm:$0xff]  ;;  %v3261_v58 = vld [vmem:[#allocation3 + $0xd0] sm:$0xff] }
 0x4a3   :  { %v1319_v53 = vmul.f32 0.5, %v1315_v48  ;;  %v1316_v56 = vadd.f32 %v1241_v52, %v3721_v55  ;;  %v1318_v62 = vadd.f32 %v1312_v5, %v3723_v61  ;;  %v3243_v48 = vld [vmem:[#allocation3 + $0xf8] sm:$0xff]  ;;  %v3249_v52 = vld [vmem:[#allocation3 + $0xf0] sm:$0xff]  ;;  %v3270_v5 = vld [vmem:[#allocation3 + $0xa0] sm:$0xff] }
 0x4a4   :  { %v3255_v55 = vld [vmem:[#allocation3 + $0xd8] sm:$0xff]  ;;  %v3273_v61 = vld [vmem:[#allocation3 + $0xb0] sm:$0xff] }
 0x4a5   :  { %2173 = vtanh.f32 %v1319_v53  ;;  %v1323_v1 = vmul.f32 0.5, %v1316_v56  ;;  %v1328_v63 = vmul.f32 0.5, %v1318_v62  ;;  %v3252_v53 = vld [vmem:[#allocation3 + $0xc8] sm:$0xff]  ;;  %v3258_v56 = vld [vmem:[#allocation3 + $0xc0] sm:$0xff] }
 0x4a6   :  { %v3276_v62 = vld [vmem:[#allocation3 + $0x88] sm:$0xff] }
 0x4a7   :  { %2175 = vtanh.f32 %v1323_v1  ;;  %v3267_v1 = vld [vmem:[#allocation3 + $0xb8] sm:$0xff]  ;;  %3727 = vst [vmem:[#allocation34_spill] sm:$0xff] %v3276_v62 }
 0x4a8   :  { %2177 = vtanh.f32 %v1317_v60  ;;  %v3264_v60 = vld [vmem:[#allocation3 + $0xa8] sm:$0xff] }
 0x4a9   :  { %2179 = vtanh.f32 %v1328_v63  ;;  %v3279_v63 = vld [vmem:[#allocation3 + $0x98] sm:$0xff] }
 0x4aa   :  { %3728 = vst [vmem:[#allocation11_spill] sm:$0xff] %v3279_v63 }
 0x4b2   :  { %v2174_v0 = vpop.eup %2173 }
 0x4b3   :  { %v1321_v2 = vadd.f32 1.0, %v2174_v0  ;;  %v3282_v0 = vld [vmem:[#allocation3 + $0x80] sm:$0xff] }
 0x4b4   :  { %v2176_v4 = vpop.eup %2175  ;;  %3729 = vst [vmem:[#allocation13_spill] sm:$0xff] %v3282_v0 }
 0x4b5   :  { %v1322_v6 = vmul.f32 0.5, %v1321_v2  ;;  %v1325_v8 = vadd.f32 1.0, %v2176_v4  ;;  %v2178_v9 = vpop.eup %2177  ;;  %v3285_v2 = vld [vmem:[#allocation3 + $0x90] sm:$0xff]  ;;  %v3288_v4 = vld [vmem:[#allocation3 + $0x68] sm:$0xff] }
 0x4b6   :  { %v2180_v17 = vpop.eup %2179  ;;  %3730 = vst [vmem:[#allocation12_spill] sm:$0xff] %v3285_v2  ;;  %3731 = vst [vmem:[#allocation15_spill] sm:$0xff] %v3288_v4 }
 0x4b7   :  { %v1326_v10 = vmul.f32 0.5, %v1325_v8  ;;  %v1333_v11 = vmul.f32 %v2178_v9, %v1322_v6  ;;  %v1330_v19 = vadd.f32 1.0, %v2180_v17  ;;  %v3291_v6 = vld [vmem:[#allocation3 + $0x78] sm:$0xff]  ;;  %v3294_v8 = vld [vmem:[#allocation3 + $0x60] sm:$0xff]  ;;  %v3297_v9 = vld [vmem:[#allocation3 + $0x70] sm:$0xff] }
 0x4b8   :  { %3732 = vst [vmem:[#allocation14_spill] sm:$0xff] %v3291_v6  ;;  %3733 = vst [vmem:[#allocation17_spill] sm:$0xff] %v3294_v8  ;;  %v3309_v17 = vld [vmem:[#allocation3 + $0x50] sm:$0xff] }
 0x4b9   :  { %v1332_v12 = vmul.f32 %v1326_v10, %v3067_v45  ;;  %v1331_v21 = vmul.f32 0.5, %v1330_v19  ;;  %v3724_v45 = vld [vmem:[#allocation31_spill] sm:$0xff]  ;;  %3734 = vst [vmem:[#allocation16_spill] sm:$0xff] %v3297_v9  ;;  %v3300_v10 = vld [vmem:[#allocation3 + $0x48] sm:$0xff]  ;;  %3738 = vst [vmem:[#allocation20_spill] sm:$0xff] %v3309_v17 }
 0x4ba   :  { %3735 = vst [vmem:[#allocation19_spill] sm:$0xff] %v3300_v10  ;;  %v3312_v19 = vld [vmem:[#allocation3 + $0x28] sm:$0xff] }
 0x4bb   :  { %v3204_v15 = vadd.f32 %v1333_v11, %v1332_v12  ;;  %v3303_v11 = vld [vmem:[#allocation3 + $0x58] sm:$0xff]  ;;  %v3306_v12 = vld [vmem:[#allocation3 + $0x40] sm:$0xff]  ;;  %3739 = vst [vmem:[#allocation23_spill] sm:$0xff] %v3312_v19 }
 0x4bc   :  { %3736 = vst [vmem:[#allocation18_spill] sm:$0xff] %v3303_v11  ;;  %3737 = vst [vmem:[#allocation21_spill] sm:$0xff] %v3306_v12 }
 0x4bd   :  { %2181 = vtanh.f32 %v3204_v15 }
 0x4ca   :  { %v2182_v23 = vpop.eup %2181 }
 0x4cb   :  { %v1336_v25 = vmul.f32 %v2182_v23, %v1331_v21  ;;  %v3315_v21 = vld [vmem:[#allocation3 + $0x38] sm:$0xff]  ;;  %v3318_v23 = vld [vmem:[#allocation3 + $0x20] sm:$0xff] }
 0x4cc   :  { %3740 = vst [vmem:[#allocation22_spill] sm:$0xff] %v3315_v21  ;;  %3741 = vst [vmem:[#allocation25_spill] sm:$0xff] %v3318_v23 }
 0x4cd   :  { %1414 = vmatmul.mubr.f32.vlgmr.msra.gmra.mxu1 %v1336_v25  ;;  %1485 = vmatmul.mubr.f32.vlgmr.msra.gmra.mxu0 %v1336_v25  ;;  %v3208_v28 = vsel %vm1342_vm13, %v1336_v25, %v3071_v38  ;;  %v3725_v38 = vld [vmem:[#allocation33_spill] sm:$0xff] }
 0x4ce   :  { %1526 = vmatpush1.msra.mxu1 %v3073_v40  ;;  %1597 = vmatpush1.msra.mxu0 %v3076_v33  ;;  %v3324_v25 = vld [vmem:[#allocation3 + $0x8] sm:$0xff] }
 0x4cf   :  { %1527 = vmatprep.subr.mxu1 %v3079_v42  ;;  %1598 = vmatprep.subr.mxu0 %v3082_v3  ;;  %3743 = vst [vmem:[#allocation27_spill] sm:$0xff] %v3324_v25 }
 0x4d0   :  { %1528 = vmatpush1.msra.mxu1 %v3085_v18  ;;  %1599 = vmatpush1.msra.mxu0 %v3088_v41 }
 0x4d1   :  { %1529 = vmatprep.subr.mxu1 %v3091_v54  ;;  %1600 = vmatprep.subr.mxu0 %v3094_v57 }
 0x4d2   :  { %1530 = vmatpush1.msra.mxu1 %v3097_v27  ;;  %1601 = vmatpush1.msra.mxu0 %v3100_v49 }
 0x4d3   :  { %1531 = vmatprep.subr.mxu1 %v3103_v14  ;;  %1602 = vmatprep.subr.mxu0 %v3106_v20 }
 0x4d4   :  { %1532 = vmatpush1.msra.mxu1 %v3109_v46  ;;  %1603 = vmatpush1.msra.mxu0 %v3112_v22 }
 0x4d5   :  { %1533 = vmatprep.subr.mxu1 %v3115_v7  ;;  %1604 = vmatprep.subr.mxu0 %v3118_v43 }
 0x4d6   :  { %1534 = vmatpush1.msra.mxu1 %v3121_v59  ;;  %1605 = vmatpush1.msra.mxu0 %v3124_v44 }
 0x4d7   :  { %1535 = vmatprep.subr.mxu1 %v3127_v31  ;;  %1606 = vmatprep.subr.mxu0 %v3130_v29 }
 0x4d8   :  { %1536 = vmatpush1.msra.mxu1 %v3133_v39  ;;  %1607 = vmatpush1.msra.mxu0 %v3724_v45 }
 0x4d9   :  { %1537 = vmatprep.subr.mxu1 %v3725_v38  ;;  %1608 = vmatprep.subr.mxu0 %v3726_v47 }
 0x4da   :  { %1538 = vmatpush1.msra.mxu1 %v3145_v35  ;;  %1609 = vmatpush1.msra.mxu0 %v3148_v36 }
 0x4db   :  { %1539 = vmatprep.subr.mxu1 %v3151_v37  ;;  %1610 = vmatprep.subr.mxu0 %v3154_v13 }
 0x4dc   :  { %1540 = vmatpush1.msra.mxu1 %v3157_v16  ;;  %1611 = vmatpush1.msra.mxu0 %v3239_v50 }
 0x4dd   :  { %1541 = vmatprep.subr.mxu1 %v3161_v34  ;;  %1612 = vmatprep.subr.mxu0 %v3243_v48 }
 0x4de   :  { %1542 = vmatpush1.msra.mxu1 %v3246_v51  ;;  %1613 = vmatpush1.msra.mxu0 %v3249_v52 }
 0x4df   :  { %1543 = vmatprep.subr.mxu1 %v3252_v53  ;;  %1614 = vmatprep.subr.mxu0 %v3255_v55 }
 0x4e0   :  { %1544 = vmatpush1.msra.mxu1 %v3258_v56  ;;  %1615 = vmatpush1.msra.mxu0 %v3261_v58 }
 0x4e1   :  { %1545 = vmatprep.subr.mxu1 %v3264_v60  ;;  %1616 = vmatprep.subr.mxu0 %v3267_v1 }
 0x4e2   :  { %1546 = vmatpush1.msra.mxu1 %v3270_v5  ;;  %1617 = vmatpush1.msra.mxu0 %v3273_v61 }
 0x4e3   :  { %1547 = vmatprep.subr.mxu1 %v3276_v62  ;;  %1618 = vmatprep.subr.mxu0 %v3279_v63 }
 0x4e4   :  { %1548 = vmatpush1.msra.mxu1 %v3282_v0  ;;  %1619 = vmatpush1.msra.mxu0 %v3285_v2 }
 0x4e5   :  { %1549 = vmatprep.subr.mxu1 %v3288_v4  ;;  %1620 = vmatprep.subr.mxu0 %v3291_v6 }
 0x4e6   :  { %1550 = vmatpush1.msra.mxu1 %v3294_v8  ;;  %1621 = vmatpush1.msra.mxu0 %v3297_v9  ;;  %v3749_v9 = vld [vmem:[#allocation44_spill] sm:$0xff] }
 0x4e7   :  { %1551 = vmatprep.subr.mxu1 %v3300_v10  ;;  %1622 = vmatprep.subr.mxu0 %v3303_v11  ;;  %v3748_v10 = vld [vmem:[#allocation45_spill] sm:$0xff] }
 0x4e8   :  { %1552 = vmatpush1.msra.mxu1 %v3306_v12  ;;  %1623 = vmatpush1.msra.mxu0 %v3309_v17  ;;  %v3327_v17 = vld [vmem:[#allocation3 + $0x18] sm:$0xff] }
 0x4e9   :  { %1553 = vmatprep.subr.mxu1 %v3312_v19  ;;  %1624 = vmatprep.subr.mxu0 %v3315_v21  ;;  %3744 = vst [vmem:[#allocation26_spill] sm:$0xff] %v3327_v17  ;;  %v3330_v19 = vld [vmem:[#allocation3] sm:$0xff]  ;;  %v3334_v21 = vld [vmem:[#allocation3 + $0x10] sm:$0xff] }
 0x4ea   :  { %1554 = vmatpush1.msra.mxu1 %v3318_v23  ;;  %1625 = vmatpush1.msra.mxu0 %v3321_v24  ;;  %3745 = vst [vmem:[#allocation29_spill] sm:$0xff] %v3330_v19  ;;  %3746 = vst [vmem:[#allocation28_spill] sm:$0xff] %v3334_v21  ;;  %v3747_v24 = vld [vmem:[#allocation43_spill] sm:$0xff] }
 0x4eb   :  { %1555 = vmatprep.subr.mxu1 %v3324_v25  ;;  %1626 = vmatprep.subr.mxu0 %v3327_v17 }
 0x4ec   :  { %1556 = vmatpush1.msra.mxu1 %v3330_v19  ;;  %1589 = vmatprep.mubr.f32.mxu1 %v3709_v26 }
 0x4ed   :  { %1627 = vmatpush1.msra.mxu0 %v3334_v21  ;;  %1660 = vmatprep.mubr.f32.mxu0 %v3709_v26  ;;  %v3750_v26 = vld [vmem:[#allocation46_spill] sm:$0xff] }
 0x4ee   :  { %1701 = vmatprep.subr.mxu1 %v3056_v30  ;;  %1772 = vmatprep.subr.mxu0 %v3059_v32 }
 0x58d   :  { %v1415_v25 = vpop.f32.mrf.mxu1  ;;  %v1486_v17 = vpop.f32.mrf.mxu0 }
 0x58e   :  { %v1491_v23 = vadd.f32 %v1415_v25, %v3747_v24  ;;  %v1493_v8 = vadd.f32 %v1486_v17, %v3749_v9  ;;  %v3758_v17 = vld [vmem:[#allocation16_spill] sm:$0xff] }
 0x58f   :  { %v1417_v12 = vpop.f32.mrf.mxu1  ;;  %v1488_v21 = vpop.f32.mrf.mxu0 }
 0x590   :  { %v1495_v11 = vmul.f32 0.5, %v1491_v23  ;;  %v1492_v19 = vadd.f32 %v1417_v12, %v3748_v10  ;;  %v1494_v4 = vadd.f32 %v1488_v21, %v3750_v26  ;;  %v3760_v21 = vld [vmem:[#allocation18_spill] sm:$0xff] }
 0x592   :  { %2183 = vtanh.f32 %v1495_v11  ;;  %v1499_v6 = vmul.f32 0.5, %v1492_v19  ;;  %v1504_v30 = vmul.f32 0.5, %v1494_v4  ;;  %v1517_v4 = vpop.permute.xlu0 %1516  ;;  %v3759_v19 = vld [vmem:[#allocation19_spill] sm:$0xff] }
 0x593   :  { %vm1518_vm14 = vcmp.eq.s32.totalorder %v1517_v4, 1  ;;  %v3769_v4 = vld [vmem:[#allocation29_spill] sm:$0xff] }
 0x594   :  { %2185 = vtanh.f32 %v1499_v6 }
 0x595   :  { %2187 = vtanh.f32 %v1493_v8 }
 0x596   :  { %2189 = vtanh.f32 %v1504_v30 }
 0x59f   :  { %v2184_v2 = vpop.eup %2183 }
 0x5a0   :  { %v1497_v32 = vadd.f32 1.0, %v2184_v2  ;;  %v3757_v2 = vld [vmem:[#allocation17_spill] sm:$0xff] }
 0x5a1   :  { %v2186_v0 = vpop.eup %2185 }
 0x5a2   :  { %v1498_v63 = vmul.f32 0.5, %v1497_v32  ;;  %v1501_v24 = vadd.f32 1.0, %v2186_v0  ;;  %v2188_v25 = vpop.eup %2187  ;;  %v3751_v32 = vld [vmem:[#allocation34_spill] sm:$0xff] }
 0x5a3   :  { %v2190_v6 = vpop.eup %2189  ;;  %v3756_v0 = vld [vmem:[#allocation14_spill] sm:$0xff] }
 0x5a4   :  { %v1502_v23 = vmul.f32 0.5, %v1501_v24  ;;  %v1509_v62 = vmul.f32 %v2188_v25, %v1498_v63  ;;  %v1506_v8 = vadd.f32 1.0, %v2190_v6  ;;  %v3755_v63 = vld [vmem:[#allocation15_spill] sm:$0xff]  ;;  %v3761_v24 = vld [vmem:[#allocation21_spill] sm:$0xff]  ;;  %v3762_v25 = vld [vmem:[#allocation20_spill] sm:$0xff] }
 0x5a5   :  { %v3765_v6 = vld [vmem:[#allocation25_spill] sm:$0xff] }
 0x5a6   :  { %v1508_v10 = vmul.f32 %v1502_v23, %v3204_v15  ;;  %v1507_v9 = vmul.f32 0.5, %v1506_v8  ;;  %v3752_v15 = vld [vmem:[#allocation11_spill] sm:$0xff]  ;;  %v3766_v8 = vld [vmem:[#allocation24_spill] sm:$0xff] }
 0x5a7   :  { %v3763_v23 = vld [vmem:[#allocation23_spill] sm:$0xff] }
 0x5a8   :  { %v3345_v11 = vadd.f32 %v1509_v62, %v1508_v10  ;;  %v3754_v62 = vld [vmem:[#allocation12_spill] sm:$0xff]  ;;  %v3764_v10 = vld [vmem:[#allocation22_spill] sm:$0xff] }
 0x5aa   :  { %2191 = vtanh.f32 %v3345_v11 }
 0x5b7   :  { %v2192_v26 = vpop.eup %2191 }
 0x5b8   :  { %v1512_v12 = vmul.f32 %v2192_v26, %v1507_v9  ;;  %v3767_v9 = vld [vmem:[#allocation27_spill] sm:$0xff]  ;;  %v3768_v26 = vld [vmem:[#allocation26_spill] sm:$0xff] }
 0x5ba   :  { %1590 = vmatmul.mubr.f32.vlgmr.msra.gmra.mxu1 %v1512_v12  ;;  %1661 = vmatmul.mubr.f32.vlgmr.msra.gmra.mxu0 %v1512_v12  ;;  %v3349_v30 = vsel %vm1518_vm14, %v1512_v12, %v3208_v28  ;;  %v3753_v28 = vld [vmem:[#allocation13_spill] sm:$0xff]  ;;  %v3770_v12 = vmov 0.0  }
 0x5bb   :  { %1702 = vmatpush1.msra.mxu1 %v3073_v40  ;;  %1773 = vmatpush1.msra.mxu0 %v3076_v33 }
 0x5bc   :  { %1703 = vmatprep.subr.mxu1 %v3079_v42  ;;  %1774 = vmatprep.subr.mxu0 %v3082_v3 }
 0x5bd   :  { %1704 = vmatpush1.msra.mxu1 %v3085_v18  ;;  %1775 = vmatpush1.msra.mxu0 %v3088_v41 }
 0x5be   :  { %1705 = vmatprep.subr.mxu1 %v3091_v54  ;;  %1776 = vmatprep.subr.mxu0 %v3094_v57 }
 0x5bf   :  { %1706 = vmatpush1.msra.mxu1 %v3097_v27  ;;  %1777 = vmatpush1.msra.mxu0 %v3100_v49 }
 0x5c0   :  { %1707 = vmatprep.subr.mxu1 %v3103_v14  ;;  %1778 = vmatprep.subr.mxu0 %v3106_v20 }
 0x5c1   :  { %1708 = vmatpush1.msra.mxu1 %v3109_v46  ;;  %1779 = vmatpush1.msra.mxu0 %v3112_v22 }
 0x5c2   :  { %1709 = vmatprep.subr.mxu1 %v3115_v7  ;;  %1780 = vmatprep.subr.mxu0 %v3118_v43 }
 0x5c3   :  { %1710 = vmatpush1.msra.mxu1 %v3121_v59  ;;  %1781 = vmatpush1.msra.mxu0 %v3124_v44 }
 0x5c4   :  { %1711 = vmatprep.subr.mxu1 %v3127_v31  ;;  %1782 = vmatprep.subr.mxu0 %v3130_v29 }
 0x5c5   :  { %1712 = vmatpush1.msra.mxu1 %v3133_v39  ;;  %1783 = vmatpush1.msra.mxu0 %v3724_v45 }
 0x5c6   :  { %1713 = vmatprep.subr.mxu1 %v3725_v38  ;;  %1784 = vmatprep.subr.mxu0 %v3726_v47 }
 0x5c7   :  { %1714 = vmatpush1.msra.mxu1 %v3145_v35  ;;  %1785 = vmatpush1.msra.mxu0 %v3148_v36 }
 0x5c8   :  { %1715 = vmatprep.subr.mxu1 %v3151_v37  ;;  %1786 = vmatprep.subr.mxu0 %v3154_v13 }
 0x5c9   :  { %1716 = vmatpush1.msra.mxu1 %v3157_v16  ;;  %1787 = vmatpush1.msra.mxu0 %v3239_v50 }
 0x5ca   :  { %1717 = vmatprep.subr.mxu1 %v3161_v34  ;;  %1788 = vmatprep.subr.mxu0 %v3243_v48 }
 0x5cb   :  { %1718 = vmatpush1.msra.mxu1 %v3246_v51  ;;  %1789 = vmatpush1.msra.mxu0 %v3249_v52 }
 0x5cc   :  { %1719 = vmatprep.subr.mxu1 %v3252_v53  ;;  %1790 = vmatprep.subr.mxu0 %v3255_v55 }
 0x5cd   :  { %1720 = vmatpush1.msra.mxu1 %v3258_v56  ;;  %1791 = vmatpush1.msra.mxu0 %v3261_v58 }
 0x5ce   :  { %1721 = vmatprep.subr.mxu1 %v3264_v60  ;;  %1792 = vmatprep.subr.mxu0 %v3267_v1 }
 0x5cf   :  { %1722 = vmatpush1.msra.mxu1 %v3270_v5  ;;  %1793 = vmatpush1.msra.mxu0 %v3273_v61 }
 0x5d0   :  { %1723 = vmatprep.subr.mxu1 %v3751_v32  ;;  %1794 = vmatprep.subr.mxu0 %v3752_v15 }
 0x5d1   :  { %1724 = vmatpush1.msra.mxu1 %v3753_v28  ;;  %1795 = vmatpush1.msra.mxu0 %v3754_v62 }
 0x5d2   :  { %1725 = vmatprep.subr.mxu1 %v3755_v63  ;;  %1796 = vmatprep.subr.mxu0 %v3756_v0 }
 0x5d3   :  { %1726 = vmatpush1.msra.mxu1 %v3757_v2  ;;  %1797 = vmatpush1.msra.mxu0 %v3758_v17  ;;  %v3775_v17 = vld [vmem:[#allocation49_spill] sm:$0xff] }
 0x5d4   :  { %1727 = vmatprep.subr.mxu1 %v3759_v19  ;;  %1798 = vmatprep.subr.mxu0 %v3760_v21  ;;  %v3771_v21 = vld [vmem:[#allocation28_spill] sm:$0xff] }
 0x5d5   :  { %1728 = vmatpush1.msra.mxu1 %v3761_v24  ;;  %1799 = vmatpush1.msra.mxu0 %v3762_v25  ;;  %v3772_v25 = vld [vmem:[#allocation9_spill] sm:$0xff] }
 0x5d6   :  { %1729 = vmatprep.subr.mxu1 %v3763_v23  ;;  %1800 = vmatprep.subr.mxu0 %v3764_v10  ;;  %v3773_v23 = vld [vmem:[#allocation10_spill] sm:$0xff] }
 0x5d7   :  { %1730 = vmatpush1.msra.mxu1 %v3765_v6  ;;  %1801 = vmatpush1.msra.mxu0 %v3766_v8  ;;  %v3774_v6 = vld [vmem:[#allocation47_spill] sm:$0xff] }
 0x5d8   :  { %1731 = vmatprep.subr.mxu1 %v3767_v9  ;;  %1802 = vmatprep.subr.mxu0 %v3768_v26 }
 0x5d9   :  { %1732 = vmatpush1.msra.mxu1 %v3769_v4  ;;  %1765 = vmatprep.mubr.f32.mxu1 %v3770_v12  ;;  %v3776_v4 = vld [vmem:[#allocation48_spill] sm:$0xff] }
 0x5da   :  { %1803 = vmatpush1.msra.mxu0 %v3771_v21  ;;  %1836 = vmatprep.mubr.f32.mxu0 %v3770_v12  ;;  %v3777_v12 = vld [vmem:[#allocation50_spill] sm:$0xff] }
 0x5db   :  { %1877 = vmatprep.subr.mxu1 %v3772_v25  ;;  %1948 = vmatprep.subr.mxu0 %v3773_v23 }
 0x67a   :  { %v1591_v10 = vpop.f32.mrf.mxu1  ;;  %v1662_v8 = vpop.f32.mrf.mxu0 }
 0x67b   :  { %v1667_v24 = vadd.f32 %v1591_v10, %v3774_v6  ;;  %v1669_v2 = vadd.f32 %v1662_v8, %v3776_v4  ;;  %v1869_v4 = vpop.permute.xlu0 %1868 }
 0x67c   :  { %v1593_v19 = vpop.f32.mrf.mxu1  ;;  %v1664_v21 = vpop.f32.mrf.mxu0  ;;  %vm1870_vm0 = vcmp.eq.s32.totalorder %v1869_v4, 1 }
 0x67d   :  { %v1671_v9 = vmul.f32 0.5, %v1667_v24  ;;  %v1668_v26 = vadd.f32 %v1593_v19, %v3775_v17  ;;  %v1670_v63 = vadd.f32 %v1664_v21, %v3777_v12 }
 0x67f   :  { %2193 = vtanh.f32 %v1671_v9  ;;  %v1675_v0 = vmul.f32 0.5, %v1668_v26  ;;  %v1680_v25 = vmul.f32 0.5, %v1670_v63  ;;  %v1693_v63 = vpop.permute.xlu1 %1692 }
 0x680   :  { %vm1694_vm15 = vcmp.eq.s32.totalorder %v1693_v63, 1  ;;  %v3805_v63 = vld [vmem:[#allocation56_spill] sm:$0xff] }
 0x681   :  { %2195 = vtanh.f32 %v1675_v0 }
 0x682   :  { %2197 = vtanh.f32 %v1669_v2 }
 0x683   :  { %2199 = vtanh.f32 %v1680_v25 }
 0x68c   :  { %v2194_v62 = vpop.eup %2193 }
 0x68d   :  { %v1673_v23 = vadd.f32 1.0, %v2194_v62 }
 0x68e   :  { %v2196_v28 = vpop.eup %2195 }
 0x68f   :  { %v1674_v15 = vmul.f32 0.5, %v1673_v23  ;;  %v1677_v10 = vadd.f32 1.0, %v2196_v28  ;;  %v2198_v6 = vpop.eup %2197 }
 0x690   :  { %v2200_v0 = vpop.eup %2199 }
 0x691   :  { %v1678_v24 = vmul.f32 0.5, %v1677_v10  ;;  %v1685_v32 = vmul.f32 %v2198_v6, %v1674_v15  ;;  %v1682_v2 = vadd.f32 1.0, %v2200_v0 }
 0x693   :  { %v1684_v17 = vmul.f32 %v1678_v24, %v3345_v11  ;;  %v1683_v8 = vmul.f32 0.5, %v1682_v2  ;;  %v3803_v24 = vld [vmem:[#allocation55_spill] sm:$0xff] }
 0x695   :  { %v3422_v19 = vadd.f32 %v1685_v32, %v1684_v17 }
 0x697   :  { %2201 = vtanh.f32 %v3422_v19 }
 0x6a4   :  { %v2202_v21 = vpop.eup %2201 }
 0x6a5   :  { %v1688_v9 = vmul.f32 %v2202_v21, %v1683_v8 }
 0x6a7   :  { %1766 = vmatmul.mubr.f32.vlgmr.msra.gmra.mxu1 %v1688_v9  ;;  %1837 = vmatmul.mubr.f32.vlgmr.msra.gmra.mxu0 %v1688_v9  ;;  %v3426_v28 = vsel %vm1694_vm15, %v1688_v9, %v3349_v30 }
 0x6a8   :  { %1878 = vmatpush1.msra.mxu1 %v3073_v40  ;;  %1949 = vmatpush1.msra.mxu0 %v3076_v33  ;;  %v3778_v40 = vld [vmem:[#allocation34_spill] sm:$0xff]  ;;  %v3779_v33 = vld [vmem:[#allocation11_spill] sm:$0xff] }
 0x6a9   :  { %1879 = vmatprep.subr.mxu1 %v3079_v42  ;;  %1950 = vmatprep.subr.mxu0 %v3082_v3  ;;  %v3780_v42 = vld [vmem:[#allocation13_spill] sm:$0xff]  ;;  %v3781_v3 = vld [vmem:[#allocation12_spill] sm:$0xff] }
 0x6aa   :  { %1880 = vmatpush1.msra.mxu1 %v3085_v18  ;;  %1951 = vmatpush1.msra.mxu0 %v3088_v41  ;;  %v3782_v18 = vld [vmem:[#allocation15_spill] sm:$0xff]  ;;  %v3783_v41 = vld [vmem:[#allocation14_spill] sm:$0xff] }
 0x6ab   :  { %1881 = vmatprep.subr.mxu1 %v3091_v54  ;;  %1952 = vmatprep.subr.mxu0 %v3094_v57  ;;  %v3784_v54 = vld [vmem:[#allocation17_spill] sm:$0xff]  ;;  %v3785_v57 = vld [vmem:[#allocation16_spill] sm:$0xff] }
 0x6ac   :  { %1882 = vmatpush1.msra.mxu1 %v3097_v27  ;;  %1953 = vmatpush1.msra.mxu0 %v3100_v49  ;;  %v3786_v27 = vld [vmem:[#allocation19_spill] sm:$0xff]  ;;  %v3787_v49 = vld [vmem:[#allocation18_spill] sm:$0xff] }
 0x6ad   :  { %1883 = vmatprep.subr.mxu1 %v3103_v14  ;;  %1954 = vmatprep.subr.mxu0 %v3106_v20  ;;  %v3788_v14 = vld [vmem:[#allocation21_spill] sm:$0xff]  ;;  %v3789_v20 = vld [vmem:[#allocation20_spill] sm:$0xff] }
 0x6ae   :  { %1884 = vmatpush1.msra.mxu1 %v3109_v46  ;;  %1955 = vmatpush1.msra.mxu0 %v3112_v22  ;;  %v3790_v46 = vld [vmem:[#allocation23_spill] sm:$0xff]  ;;  %v3791_v22 = vld [vmem:[#allocation22_spill] sm:$0xff] }
 0x6af   :  { %1885 = vmatprep.subr.mxu1 %v3115_v7  ;;  %1956 = vmatprep.subr.mxu0 %v3118_v43  ;;  %v3792_v7 = vld [vmem:[#allocation25_spill] sm:$0xff]  ;;  %v3793_v43 = vld [vmem:[#allocation24_spill] sm:$0xff] }
 0x6b0   :  { %1886 = vmatpush1.msra.mxu1 %v3121_v59  ;;  %1957 = vmatpush1.msra.mxu0 %v3124_v44  ;;  %v3794_v59 = vld [vmem:[#allocation27_spill] sm:$0xff]  ;;  %v3795_v44 = vld [vmem:[#allocation26_spill] sm:$0xff] }
 0x6b1   :  { %1887 = vmatprep.subr.mxu1 %v3127_v31  ;;  %1958 = vmatprep.subr.mxu0 %v3130_v29  ;;  %v3796_v31 = vld [vmem:[#allocation29_spill] sm:$0xff]  ;;  %v3797_v29 = vmov 0.0  }
 0x6b2   :  { %1888 = vmatpush1.msra.mxu1 %v3133_v39  ;;  %1959 = vmatpush1.msra.mxu0 %v3724_v45  ;;  %v3798_v39 = vld [vmem:[#allocation28_spill] sm:$0xff]  ;;  %v3800_v45 = vld [vmem:[#allocation53_spill] sm:$0xff] }
 0x6b3   :  { %1889 = vmatprep.subr.mxu1 %v3725_v38  ;;  %1960 = vmatprep.subr.mxu0 %v3726_v47  ;;  %v3801_v47 = vld [vmem:[#allocation52_spill] sm:$0xff] }
 0x6b4   :  { %1890 = vmatpush1.msra.mxu1 %v3145_v35  ;;  %1961 = vmatpush1.msra.mxu0 %v3148_v36 }
 0x6b5   :  { %1891 = vmatprep.subr.mxu1 %v3151_v37  ;;  %1962 = vmatprep.subr.mxu0 %v3154_v13 }
 0x6b6   :  { %1892 = vmatpush1.msra.mxu1 %v3157_v16  ;;  %1963 = vmatpush1.msra.mxu0 %v3239_v50  ;;  %v3799_v16 = vld [vmem:[#allocation51_spill] sm:$0xff] }
 0x6b7   :  { %1893 = vmatprep.subr.mxu1 %v3161_v34  ;;  %1964 = vmatprep.subr.mxu0 %v3243_v48 }
 0x6b8   :  { %1894 = vmatpush1.msra.mxu1 %v3246_v51  ;;  %1965 = vmatpush1.msra.mxu0 %v3249_v52  ;;  %v3802_v52 = vld [vmem:[#allocation54_spill] sm:$0xff] }
 0x6b9   :  { %1895 = vmatprep.subr.mxu1 %v3252_v53  ;;  %1966 = vmatprep.subr.mxu0 %v3255_v55 }
 0x6ba   :  { %1896 = vmatpush1.msra.mxu1 %v3258_v56  ;;  %1967 = vmatpush1.msra.mxu0 %v3261_v58 }
 0x6bb   :  { %1897 = vmatprep.subr.mxu1 %v3264_v60  ;;  %1968 = vmatprep.subr.mxu0 %v3267_v1 }
 0x6bc   :  { %1898 = vmatpush1.msra.mxu1 %v3270_v5  ;;  %1969 = vmatpush1.msra.mxu0 %v3273_v61 }
 0x6bd   :  { %1899 = vmatprep.subr.mxu1 %v3778_v40  ;;  %1970 = vmatprep.subr.mxu0 %v3779_v33 }
 0x6be   :  { %1900 = vmatpush1.msra.mxu1 %v3780_v42  ;;  %1971 = vmatpush1.msra.mxu0 %v3781_v3  ;;  %v3806_v42 = vld [vmem:[#allocation58_spill] sm:$0xff] }
 0x6bf   :  { %1901 = vmatprep.subr.mxu1 %v3782_v18  ;;  %1972 = vmatprep.subr.mxu0 %v3783_v41 }
 0x6c0   :  { %1902 = vmatpush1.msra.mxu1 %v3784_v54  ;;  %1973 = vmatpush1.msra.mxu0 %v3785_v57 }
 0x6c1   :  { %1903 = vmatprep.subr.mxu1 %v3786_v27  ;;  %1974 = vmatprep.subr.mxu0 %v3787_v49 }
 0x6c2   :  { %1904 = vmatpush1.msra.mxu1 %v3788_v14  ;;  %1975 = vmatpush1.msra.mxu0 %v3789_v20 }
 0x6c3   :  { %1905 = vmatprep.subr.mxu1 %v3790_v46  ;;  %1976 = vmatprep.subr.mxu0 %v3791_v22 }
 0x6c4   :  { %1906 = vmatpush1.msra.mxu1 %v3792_v7  ;;  %1977 = vmatpush1.msra.mxu0 %v3793_v43 }
 0x6c5   :  { %1907 = vmatprep.subr.mxu1 %v3794_v59  ;;  %1978 = vmatprep.subr.mxu0 %v3795_v44  ;;  %v2045_v59 = vpop.permute.xlu1 %2044 }
 0x6c6   :  { %1908 = vmatpush1.msra.mxu1 %v3796_v31  ;;  %1941 = vmatprep.mubr.f32.mxu1 %v3797_v29  ;;  %vm2046_vm1 = vcmp.eq.s32.totalorder %v2045_v59, 1 }
 0x6c7   :  { %1979 = vmatpush1.msra.mxu0 %v3798_v39  ;;  %2012 = vmatprep.mubr.f32.mxu0 %v3797_v29 }
 0x767   :  { %v1767_v13 = vpop.f32.mrf.mxu1  ;;  %v1838_v35 = vpop.f32.mrf.mxu0 }
 0x768   :  { %v1843_v34 = vadd.f32 %v1767_v13, %v3799_v16  ;;  %v1845_v50 = vadd.f32 %v1838_v35, %v3801_v47 }
 0x769   :  { %v1769_v36 = vpop.f32.mrf.mxu1  ;;  %v1840_v51 = vpop.f32.mrf.mxu0 }
 0x76a   :  { %v1847_v37 = vmul.f32 0.5, %v1843_v34  ;;  %v1844_v38 = vadd.f32 %v1769_v36, %v3800_v45  ;;  %v1846_v53 = vadd.f32 %v1840_v51, %v3802_v52 }
 0x76c   :  { %2203 = vtanh.f32 %v1847_v37  ;;  %v1851_v48 = vmul.f32 0.5, %v1844_v38  ;;  %v1856_v55 = vmul.f32 0.5, %v1846_v53 }
 0x76e   :  { %2205 = vtanh.f32 %v1851_v48 }
 0x76f   :  { %2207 = vtanh.f32 %v1845_v50 }
 0x770   :  { %2209 = vtanh.f32 %v1856_v55 }
 0x779   :  { %v2204_v56 = vpop.eup %2203 }
 0x77a   :  { %v1849_v58 = vadd.f32 1.0, %v2204_v56 }
 0x77b   :  { %v2206_v60 = vpop.eup %2205 }
 0x77c   :  { %v1850_v1 = vmul.f32 0.5, %v1849_v58  ;;  %v1853_v5 = vadd.f32 1.0, %v2206_v60  ;;  %v2208_v61 = vpop.eup %2207 }
 0x77d   :  { %v2210_v62 = vpop.eup %2209 }
 0x77e   :  { %v1854_v11 = vmul.f32 0.5, %v1853_v5  ;;  %v1861_v30 = vmul.f32 %v2208_v61, %v1850_v1  ;;  %v1858_v26 = vadd.f32 1.0, %v2210_v62 }
 0x780   :  { %v1860_v32 = vmul.f32 %v1854_v11, %v3422_v19  ;;  %v1859_v12 = vmul.f32 0.5, %v1858_v26  ;;  %v3804_v19 = vld [vmem:[#allocation57_spill] sm:$0xff] }
 0x782   :  { %v1862_v15 = vadd.f32 %v1861_v30, %v1860_v32 }
 0x784   :  { %2211 = vtanh.f32 %v1862_v15 }
 0x791   :  { %v2212_v25 = vpop.eup %2211 }
 0x792   :  { %v1864_v23 = vmul.f32 %v2212_v25, %v1859_v12 }
 0x794   :  { %1942 = vmatmul.mubr.f32.vlgmr.msra.gmra.mxu1 %v1864_v23  ;;  %2013 = vmatmul.mubr.f32.vlgmr.msra.gmra.mxu0 %v1864_v23  ;;  %v1871_v10 = vsel %vm1870_vm0, %v1864_v23, %v3426_v28 }
 0x854   :  { %v1943_v6 = vpop.f32.mrf.mxu1  ;;  %v2014_v0 = vpop.f32.mrf.mxu0 }
 0x855   :  { %v2019_v17 = vadd.f32 %v1943_v6, %v3803_v24  ;;  %v2021_v9 = vadd.f32 %v2014_v0, %v3805_v63 }
 0x856   :  { %v1945_v2 = vpop.f32.mrf.mxu1  ;;  %v2016_v33 = vpop.f32.mrf.mxu0 }
 0x857   :  { %v2023_v8 = vmul.f32 0.5, %v2019_v17  ;;  %v2020_v21 = vadd.f32 %v1945_v2, %v3804_v19  ;;  %v2022_v3 = vadd.f32 %v2016_v33, %v3806_v42 }
 0x859   :  { %2213 = vtanh.f32 %v2023_v8  ;;  %v2027_v40 = vmul.f32 0.5, %v2020_v21  ;;  %v2032_v18 = vmul.f32 0.5, %v2022_v3 }
 0x85b   :  { %2215 = vtanh.f32 %v2027_v40 }
 0x85c   :  { %2217 = vtanh.f32 %v2021_v9 }
 0x85d   :  { %2219 = vtanh.f32 %v2032_v18 }
 0x866   :  { %v2214_v41 = vpop.eup %2213 }
 0x867   :  { %v2025_v28 = vadd.f32 1.0, %v2214_v41 }
 0x868   :  { %v2216_v54 = vpop.eup %2215 }
 0x869   :  { %v2026_v57 = vmul.f32 0.5, %v2025_v28  ;;  %v2029_v27 = vadd.f32 1.0, %v2216_v54  ;;  %v2218_v49 = vpop.eup %2217 }
 0x86a   :  { %v2220_v7 = vpop.eup %2219 }
 0x86b   :  { %v2030_v14 = vmul.f32 0.5, %v2029_v27  ;;  %v2037_v20 = vmul.f32 %v2218_v49, %v2026_v57  ;;  %v2034_v43 = vadd.f32 1.0, %v2220_v7 }
 0x86d   :  { %v2036_v46 = vmul.f32 %v2030_v14, %v1862_v15  ;;  %v2035_v44 = vmul.f32 0.5, %v2034_v43 }
 0x86f   :  { %v2038_v22 = vadd.f32 %v2037_v20, %v2036_v46 }
 0x871   :  { %2221 = vtanh.f32 %v2038_v22 }
 0x87e   :  { %v2222_v31 = vpop.eup %2221 }
 0x87f   :  { %v2040_v29 = vmul.f32 %v2222_v31, %v2035_v44 }
 0x881   :  { %v2047_v39 = vsel %vm2046_vm1, %v2040_v29, %v1871_v10 }
 0x882   :  { %2048 = vst [vmem:[#allocation6] sm:$0xff] %v2047_v39 }
 0x883   :  { %2318 = shalt.err (!%p2315_p9)
}
 0x884   :  { %2058 = dma.vmem_to_hbm [thread:$0]  %s2056_s28, 128, %s3513_s8, [#allocation5]  }
 0x885   :  { %2329 = dma.done.wait [#allocation5], 128  }
 0x886   :  { %2330 = vsyncadd [#allocation5], 4294967168 }
 0x887   :  { %2062 = vsyncpa [#allocation4], 1 }
 0x888   :  { %2063 = vsyncpa [#allocation5], 1 }

</bundles_post_ra>
